<compile_context>
chip_gen: v6e
topology: v6e:2x2x1
jax: 0.10.0
libtpu: 0.0.40
codegen_flags: <defaults>
</compile_context>

<pallas_src>
import functools

import jax
import jax.numpy as jnp
from jax.experimental import pallas as pl
from jax.experimental.pallas import tpu as pltpu


def _round_up(n, m):
    return ((n + m - 1) // m) * m


def _mlp_kernel(x_ref, w1_ref, b1_ref, w2_ref, b2_ref, o_ref):
    # Fused: bf16 matmul -> f32 bias -> ReLU -> (dropout=identity) -> bf16 matmul + bias.
    x = x_ref[...].astype(jnp.bfloat16)                        # cast inside kernel
    h = jnp.dot(x, w1_ref[...],
                preferred_element_type=jnp.float32)            # [B, Hp] f32 (MXU)
    h = jnp.maximum(h + b1_ref[...], 0.0)                      # bias + ReLU (VPU)
    # TODO(synk): nn.Dropout(0.5) is identity in eval mode; a training-mode
    # variant would mask `h` via pltpu.prng_seed + pltpu.prng_random_bits and
    # rescale by 1/(1-p).
    h = h.astype(jnp.bfloat16)
    o_ref[...] = (jnp.dot(h, w2_ref[...],
                          preferred_element_type=jnp.float32)  # [B, Np] f32 (MXU)
                  + b2_ref[...])                               # fused bias2


def prepare_params(w1, b1, w2, b2):
    """Pad + cast params once, outside the hot path.

    Inputs:  w1 [dim, hidden] f32, b1 [1, hidden] f32,
             w2 [hidden, n_classes] f32, b2 [1, n_classes] f32.
    Returns: bf16 padded w1/w2, f32 padded b1/b2, and n_classes for un-padding.
    """
    dim, hidden = w1.shape
    n_classes = w2.shape[1]
    assert b1.shape == (1, hidden), "b1 must be [1, hidden]"
    assert w2.shape == (hidden, n_classes), "w2 must be [hidden, n_classes] (torch W.T)"
    assert b2.shape == (1, n_classes), "b2 must be [1, n_classes]"

    Hp = _round_up(hidden, 128)        # 1000 -> 1024 (lane-aligned hidden)
    Np = _round_up(n_classes, 128)     # 2 -> 128 (lane-dense output stores)

    # Invariant (correctness of padding): padded b1 cols are 0 (ReLU(0)=0) and
    # padded w2 rows are 0, so padded hidden columns contribute nothing.
    w1p = jnp.zeros((dim, Hp), jnp.bfloat16).at[:, :hidden].set(w1.astype(jnp.bfloat16))
    b1p = jnp.zeros((1, Hp), jnp.float32).at[:, :hidden].set(b1)
    w2p = jnp.zeros((Hp, Np), jnp.bfloat16).at[:hidden, :n_classes].set(
        w2.astype(jnp.bfloat16))
    b2p = jnp.zeros((1, Np), jnp.float32).at[:, :n_classes].set(b2)
    return w1p, b1p, w2p, b2p, n_classes


@functools.partial(jax.jit, static_argnames=("n_classes",))
def classifier_forward(x, w1p, b1p, w2p, b2p, n_classes):
    """x: [B, dim] f32/bf16; padded params from prepare_params. Returns [B, n_classes] f32."""
    B, dim = x.shape
    Hp = w1p.shape[1]
    Np = w2p.shape[1]

    flops = 2 * B * dim * Hp + 2 * B * Hp * Np
    bytes_accessed = (x.size * x.dtype.itemsize
                      + w1p.size * 2 + b1p.size * 4
                      + w2p.size * 2 + b2p.size * 4
                      + B * Np * 4)

    out = pl.pallas_call(
        _mlp_kernel,
        out_shape=jax.ShapeDtypeStruct((B, Np), jnp.float32),
        grid_spec=pl.GridSpec(
            grid=(1,),                                       # single step: launch-bound op
            in_specs=[
                pl.BlockSpec((B, dim), lambda i: (0, 0)),    # x (f32, cast in kernel)
                pl.BlockSpec((dim, Hp), lambda i: (0, 0)),   # w1 (bf16)
                pl.BlockSpec((1, Hp), lambda i: (0, 0)),     # b1 (f32)
                pl.BlockSpec((Hp, Np), lambda i: (0, 0)),    # w2 (bf16)
                pl.BlockSpec((1, Np), lambda i: (0, 0)),     # b2 (f32, fused in-kernel)
            ],
            out_specs=pl.BlockSpec((B, Np), lambda i: (0, 0)),
        ),
        compiler_params=pltpu.CompilerParams(
            dimension_semantics=("arbitrary",)),
        cost_estimate=pl.CostEstimate(
            flops=flops, transcendentals=0, bytes_accessed=bytes_accessed),
    )(x, w1p, b1p, w2p, b2p)

    # Slice off lane padding inside the same jit so it fuses (no extra dispatch).
    return out[:, :n_classes]


def init_params(key, dim, hidden, n_classes):
    # Deterministic synthetic init (roughly PyTorch's uniform(-1/sqrt(fan_in), ...)).
    k1, k2, k3, k4 = jax.random.split(key, 4)
    bound1 = 1.0 / jnp.sqrt(dim)
    bound2 = 1.0 / jnp.sqrt(hidden)
    w1 = jax.random.uniform(k1, (dim, hidden), jnp.float32, -bound1, bound1)
    b1 = jax.random.uniform(k2, (1, hidden), jnp.float32, -bound1, bound1)
    w2 = jax.random.uniform(k3, (hidden, n_classes), jnp.float32, -bound2, bound2)
    b2 = jax.random.uniform(k4, (1, n_classes), jnp.float32, -bound2, bound2)
    return w1, b1, w2, b2


if __name__ == "__main__":
    key = jax.random.PRNGKey(0)
    B, dim, hidden, n_classes = 8, 512, 1000, 2   # dog/cat classifier head

    kx, kp = jax.random.split(key)
    x = jax.random.normal(kx, (B, dim), jnp.float32)
    w1, b1, w2, b2 = init_params(kp, dim, hidden, n_classes)

    # One-time weight prep (pad + bf16 cast), then the single fused forward call.
    w1p, b1p, w2p, b2p, ncls = prepare_params(w1, b1, w2, b2)
    out = classifier_forward(x, w1p, b1p, w2p, b2p, ncls)
    out = jax.block_until_ready(out)

    # Reference check against plain f32 JAX (dropout=identity in eval).
    # Tolerance loosened for the bf16 weight/activation cast.
    ref = jnp.maximum(x @ w1 + b1, 0.0) @ w2 + b2
    assert out.shape == (B, n_classes)
    assert jnp.allclose(out, ref, atol=2e-2, rtol=2e-2), "mismatch vs reference"

    print("KERNEL_OK")
</pallas_src>

<mosaic_0001>
module attributes {stable_mosaic.version = 11 : i64} {
  func.func @_mlp_kernel(%arg0: i32, %arg1: memref<8x512xf32, #tpu.memory_space<vmem>>, %arg2: memref<512x1024xbf16, #tpu.memory_space<vmem>>, %arg3: memref<1x1024xf32, #tpu.memory_space<vmem>>, %arg4: memref<1024x128xbf16, #tpu.memory_space<vmem>>, %arg5: memref<1x128xf32, #tpu.memory_space<vmem>>, %arg6: memref<8x128xf32, #tpu.memory_space<vmem>>) attributes {dimension_semantics = [#tpu.dimension_semantics<arbitrary>], iteration_bounds = array<i64: 1>, scalar_prefetch = 0 : i64, scratch_operands = 0 : i64, tpu.core_type = #tpu.core_type<tc>, window_params = [{pipeline_mode = #tpu.pipeline_mode<synchronous>, transform_indices = @transform_0, window_bounds = array<i64: 8, 512>}, {pipeline_mode = #tpu.pipeline_mode<synchronous>, transform_indices = @transform_1, window_bounds = array<i64: 512, 1024>}, {pipeline_mode = #tpu.pipeline_mode<synchronous>, transform_indices = @transform_2, window_bounds = array<i64: 1, 1024>}, {pipeline_mode = #tpu.pipeline_mode<synchronous>, transform_indices = @transform_3, window_bounds = array<i64: 1024, 128>}, {pipeline_mode = #tpu.pipeline_mode<synchronous>, transform_indices = @transform_4, window_bounds = array<i64: 1, 128>}, {pipeline_mode = #tpu.pipeline_mode<synchronous>, transform_indices = @transform_5, window_bounds = array<i64: 8, 128>}]} {
    %c0 = arith.constant 0 : index
    %c0_0 = arith.constant 0 : index
    %0 = vector.load %arg1[%c0, %c0_0] : memref<8x512xf32, #tpu.memory_space<vmem>>, vector<8x512xf32>
    %1 = arith.truncf %0 : vector<8x512xf32> to vector<8x512xbf16>
    %c0_1 = arith.constant 0 : index
    %c0_2 = arith.constant 0 : index
    %2 = vector.load %arg2[%c0_1, %c0_2] : memref<512x1024xbf16, #tpu.memory_space<vmem>>, vector<512x1024xbf16>
    %cst = arith.constant dense<0.000000e+00> : vector<8x1024xf32>
    %3 = tpu.matmul %1, %2, %cst {dimension_numbers = #tpu.dot_dimension_numbers<[1], [0], [0], [1], [0, 0, 1, 1], [], []>} : vector<8x512xbf16>, vector<512x1024xbf16>, vector<8x1024xf32> -> vector<8x1024xf32>
    %c0_3 = arith.constant 0 : index
    %c0_4 = arith.constant 0 : index
    %4 = vector.load %arg3[%c0_3, %c0_4] : memref<1x1024xf32, #tpu.memory_space<vmem>>, vector<1x1024xf32>
    %5 = vector.broadcast %4 : vector<1x1024xf32> to vector<8x1024xf32>
    %6 = arith.addf %3, %5 : vector<8x1024xf32>
    %cst_5 = arith.constant 0.000000e+00 : f32
    %7 = vector.broadcast %cst_5 : f32 to vector<8x1024xf32>
    %8 = arith.maximumf %6, %7 : vector<8x1024xf32>
    %9 = arith.truncf %8 : vector<8x1024xf32> to vector<8x1024xbf16>
    %c0_6 = arith.constant 0 : index
    %c0_7 = arith.constant 0 : index
    %10 = vector.load %arg4[%c0_6, %c0_7] : memref<1024x128xbf16, #tpu.memory_space<vmem>>, vector<1024x128xbf16>
    %cst_8 = arith.constant dense<0.000000e+00> : vector<8x128xf32>
    %11 = tpu.matmul %9, %10, %cst_8 {dimension_numbers = #tpu.dot_dimension_numbers<[1], [0], [0], [1], [0, 0, 1, 1], [], []>} : vector<8x1024xbf16>, vector<1024x128xbf16>, vector<8x128xf32> -> vector<8x128xf32>
    %c0_9 = arith.constant 0 : index
    %c0_10 = arith.constant 0 : index
    %12 = vector.load %arg5[%c0_9, %c0_10] : memref<1x128xf32, #tpu.memory_space<vmem>>, vector<1x128xf32>
    %13 = vector.broadcast %12 : vector<1x128xf32> to vector<8x128xf32>
    %14 = arith.addf %11, %13 : vector<8x128xf32>
    %c0_11 = arith.constant 0 : index
    %c0_12 = arith.constant 0 : index
    %15 = vector.load %arg6[%c0_11, %c0_12] : memref<8x128xf32, #tpu.memory_space<vmem>>, vector<8x128xf32>
    tpu.vector_store %arg6[%c0_11, %c0_12], %14 {strides = array<i32>} : memref<8x128xf32, #tpu.memory_space<vmem>>, vector<8x128xf32>,
    return
  }
  func.func @transform_0(%arg0: i32) -> (i32, i32) {
    %c0_i32 = arith.constant 0 : i32
    %c0_i32_0 = arith.constant 0 : i32
    %c0_i32_1 = arith.constant 0 : i32
    return %c0_i32, %c0_i32_0 : i32, i32
  }
  func.func @transform_1(%arg0: i32) -> (i32, i32) {
    %c0_i32 = arith.constant 0 : i32
    %c0_i32_0 = arith.constant 0 : i32
    %c0_i32_1 = arith.constant 0 : i32
    return %c0_i32, %c0_i32_0 : i32, i32
  }
  func.func @transform_2(%arg0: i32) -> (i32, i32) {
    %c0_i32 = arith.constant 0 : i32
    %c0_i32_0 = arith.constant 0 : i32
    %c0_i32_1 = arith.constant 0 : i32
    return %c0_i32, %c0_i32_0 : i32, i32
  }
  func.func @transform_3(%arg0: i32) -> (i32, i32) {
    %c0_i32 = arith.constant 0 : i32
    %c0_i32_0 = arith.constant 0 : i32
    %c0_i32_1 = arith.constant 0 : i32
    return %c0_i32, %c0_i32_0 : i32, i32
  }
  func.func @transform_4(%arg0: i32) -> (i32, i32) {
    %c0_i32 = arith.constant 0 : i32
    %c0_i32_0 = arith.constant 0 : i32
    %c0_i32_1 = arith.constant 0 : i32
    return %c0_i32, %c0_i32_0 : i32, i32
  }
  func.func @transform_5(%arg0: i32) -> (i32, i32) {
    %c0_i32 = arith.constant 0 : i32
    %c0_i32_0 = arith.constant 0 : i32
    %c0_i32_1 = arith.constant 0 : i32
    return %c0_i32, %c0_i32_0 : i32, i32
  }
}

</mosaic_0001>

<bundles_post_ra>
// kernel: classifier_forward.1
= control target key start
LH: loop header
LB: loop body
LE: loop exit
PB: predicated region body
PF: predicated region fallthrough
CT: control target
= control target key end

     0   :  { %10 = vsyncpa [#allocation3], 0  ;;  %s3356_s0 = inlined_call_operand.hbm [shape: f32[8,512], index: 0, kind: input, shape index: {}]   ;;  %s3357_s1 = inlined_call_operand.hbm [shape: bf16[512,1024], index: 1, kind: input, shape index: {}]   ;;  %s3358_s2 = inlined_call_operand.hbm [shape: f32[1,1024], index: 2, kind: input, shape index: {}]   ;;  %s3359_s3 = inlined_call_operand.hbm [shape: bf16[1024,128], index: 3, kind: input, shape index: {}]   ;;  %s3360_s4 = inlined_call_operand.vmem [shape: f32[1,128], index: 4, kind: input, shape index: {}]   ;;  %s3361_s5 = inlined_call_operand.vmem [shape: f32[8,128], index: 5, kind: output, shape index: {}]  }
   0x1   :  { %11 = vsyncpa [#allocation5], 0 }
   0x2   :  { %12 = vsyncpa [#allocation8], 0  ;;  %s3256_s18 = smov [#allocation4]  }
   0x3   :  { %s28_s19 = sshll.u32 %s3256_s18, 4  ;;  %s29_s19 = int_to_ptr.vmem [resolvable:$true] %s28_s19 }
   0x4   :  { %s3178_s20 = scalar_lea.vmem %s29_s19, 32768  ;;  %p3183_p1 = scmp.lt.s32.totalorder %s29_s19, %s29_s19 }
   0x5   :  { %p3179_p0 = scmp.ne.s32.totalorder %s29_s19, %s3178_s20  ;;  %p3184_p2 = scmp.lt.s32.totalorder %s3178_s20, %s3178_s20 }
   0x7   :  { %p3185_p3 = por %p3184_p2, %p3183_p1 }
   0x9   :  { %p3186_p4 = pnand %p3185_p3, %p3179_p0 }
   0xb   :  { %3189 = shalt.err (!%p3186_p4)
}
   0xc   :  { %s3257_s21 = smov 512   ;;  %s3258_s22 = smov 32  }
   0xd   :  { %34 = dma.hbm_to_vmem [thread:$0]  %s3357_s1, 32768, %s29_s19, [#allocation5], %s3257_s21, %s3257_s21, %s3258_s22  }
   0xe   :  { %s3259_s25 = smov [#allocation2]   ;;  %s3260_s27 = smov [#allocation6]  }
   0xf   :  { %s19_s26 = sshll.u32 %s3259_s25, 4  ;;  %s41_s28 = sshll.u32 %s3260_s27, 4  ;;  %s20_s26 = int_to_ptr.vmem [resolvable:$true] %s19_s26  ;;  %s42_s28 = int_to_ptr.vmem [resolvable:$true] %s41_s28 }
  0x10   :  { %s3198_s29 = scalar_lea.vmem %s20_s26, 512  ;;  %p3203_p6 = scmp.lt.s32.totalorder %s20_s26, %s20_s26 }
  0x11   :  { %p3199_p5 = scmp.ne.s32.totalorder %s20_s26, %s3198_s29  ;;  %p3204_p7 = scmp.lt.s32.totalorder %s3198_s29, %s3198_s29 }
  0x13   :  { %p3205_p8 = por %p3204_p7, %p3203_p6 }
  0x15   :  { %p3206_p9 = pnand %p3205_p8, %p3199_p5 }
  0x17   :  { %3209 = shalt.err (!%p3206_p9)
}
  0x18   :  { %22 = dma.hbm_to_vmem [thread:$0]  %s3356_s0, 512, %s20_s26, [#allocation3]  }
  0x19   :  { %s3218_s7 = scalar_lea.vmem %s42_s28, 128  ;;  %p3223_p11 = scmp.lt.s32.totalorder %s42_s28, %s42_s28 }
  0x1a   :  { %p3219_p10 = scmp.ne.s32.totalorder %s42_s28, %s3218_s7  ;;  %p3224_p12 = scmp.lt.s32.totalorder %s3218_s7, %s3218_s7 }
  0x1c   :  { %p3225_p13 = por %p3224_p12, %p3223_p11 }
  0x1e   :  { %p3226_p0 = pnand %p3225_p13, %p3219_p10 }
  0x20   :  { %3229 = shalt.err (!%p3226_p0)
}
  0x21   :  { %44 = dma.hbm_to_vmem [thread:$0]  %s3358_s2, 128, %s42_s28, [#allocation5]  }
  0x22   :  { %s3261_s9 = smov [#allocation7]  }
  0x23   :  { %s50_s10 = sshll.u32 %s3261_s9, 4  ;;  %s51_s10 = int_to_ptr.vmem [resolvable:$true] %s50_s10 }
  0x24   :  { %s3238_s11 = scalar_lea.vmem %s51_s10, 8192  ;;  %p3243_p2 = scmp.lt.s32.totalorder %s51_s10, %s51_s10 }
  0x25   :  { %p3239_p1 = scmp.ne.s32.totalorder %s51_s10, %s3238_s11  ;;  %p3244_p3 = scmp.lt.s32.totalorder %s3238_s11, %s3238_s11 }
  0x27   :  { %p3245_p4 = por %p3244_p3, %p3243_p2 }
  0x29   :  { %p3246_p5 = pnand %p3245_p4, %p3239_p1 }
  0x2b   :  { %3249 = shalt.err (!%p3246_p5)
}
  0x2c   :  { %s3262_s0 = smov 64   ;;  %s3263_s12 = smov 4  }
  0x2d   :  { %56 = dma.hbm_to_vmem [thread:$0]  %s3359_s3, 8192, %s51_s10, [#allocation8], %s3262_s0, %s3262_s0, %s3263_s12  }
  0x2e   :  { %3250 = dma.done.wait [#allocation3], 512  }
  0x2f   :  { %3251 = vsyncadd [#allocation3], 4294966784 }
  0x30   :  { %3252 = dma.done.wait [#allocation5], 32896  }
  0x31   :  { %3253 = vsyncadd [#allocation5], 4294934400 }
  0x32   :  { %3254 = dma.done.wait [#allocation8], 8192  }
  0x33   :  { %3255 = vsyncadd [#allocation8], 4294959104  ;;  %v136_v0 = vld [vmem:[#allocation4 + $0x1c0] sm:$0xff]  ;;  %v73_v53 = vld [vmem:[#allocation2 + $0x8] sm:$0xff] }
  0x34   :  { %v140_v1 = vld [vmem:[#allocation4 + $0x1e0] sm:$0xff]  ;;  %v75_v54 = vld [vmem:[#allocation2 + $0x18] sm:$0xff]  ;;  %v3306_v58 = vpack.c.bf16 %v73_v53, %v73_v53 }
  0x35   :  { %v264_v2 = vld [vmem:[#allocation4 + $0x5c0] sm:$0xff]  ;;  %v2746_v3 = vcombine.high %v136_v0, %v140_v1  ;;  %v2745_v5 = vcombine.low %v136_v0, %v140_v1  ;;  %v3308_v59 = vpack.c.bf16 %v75_v54, %v75_v54 }
  0x36   :  { %v268_v4 = vld [vmem:[#allocation4 + $0x5e0] sm:$0xff]  ;;  %1690 = vmatprep.mubr.bf16.mxu0 %v3306_v58 }
  0x37   :  { %v128_v6 = vld [vmem:[#allocation4 + $0x180] sm:$0xff]  ;;  %v2874_v8 = vcombine.high %v264_v2, %v268_v4  ;;  %v2873_v9 = vcombine.low %v264_v2, %v268_v4  ;;  %1658 = vmatprep.subr.bf16.mxu0 %v2746_v3  ;;  %1731 = vmatprep.mubr.bf16.mxu1 %v3308_v59 }
  0x38   :  { %v132_v7 = vld [vmem:[#allocation4 + $0x1a0] sm:$0xff]  ;;  %1659 = vmatpush1.bf16.msra.mxu0 %v2745_v5 }
  0x39   :  { %v2738_v10 = vcombine.high %v128_v6, %v132_v7  ;;  %v256_v11 = vld [vmem:[#allocation4 + $0x580] sm:$0xff]  ;;  %1699 = vmatprep.subr.bf16.mxu1 %v2874_v8  ;;  %v2737_v18 = vcombine.low %v128_v6, %v132_v7 }
  0x3a   :  { %v260_v12 = vld [vmem:[#allocation4 + $0x5a0] sm:$0xff]  ;;  %1700 = vmatpush1.bf16.msra.mxu1 %v2873_v9 }
  0x3b   :  { %v120_v13 = vld [vmem:[#allocation4 + $0x140] sm:$0xff]  ;;  %v2866_v14 = vcombine.high %v256_v11, %v260_v12  ;;  %1660 = vmatprep.subr.bf16.mxu0 %v2738_v10  ;;  %v2865_v19 = vcombine.low %v256_v11, %v260_v12 }
  0x3c   :  { %v124_v15 = vld [vmem:[#allocation4 + $0x160] sm:$0xff]  ;;  %1661 = vmatpush1.bf16.msra.mxu0 %v2737_v18 }
  0x3d   :  { %v248_v16 = vld [vmem:[#allocation4 + $0x540] sm:$0xff]  ;;  %v2730_v20 = vcombine.high %v120_v13, %v124_v15  ;;  %1701 = vmatprep.subr.bf16.mxu1 %v2866_v14  ;;  %v2729_v26 = vcombine.low %v120_v13, %v124_v15 }
  0x3e   :  { %v252_v17 = vld [vmem:[#allocation4 + $0x560] sm:$0xff]  ;;  %1702 = vmatpush1.bf16.msra.mxu1 %v2865_v19 }
  0x3f   :  { %v2858_v21 = vcombine.high %v248_v16, %v252_v17  ;;  %v112_v22 = vld [vmem:[#allocation4 + $0x100] sm:$0xff]  ;;  %1662 = vmatprep.subr.bf16.mxu0 %v2730_v20  ;;  %v2857_v27 = vcombine.low %v248_v16, %v252_v17 }
  0x40   :  { %v116_v23 = vld [vmem:[#allocation4 + $0x120] sm:$0xff]  ;;  %1663 = vmatpush1.bf16.msra.mxu0 %v2729_v26 }
  0x41   :  { %v240_v24 = vld [vmem:[#allocation4 + $0x500] sm:$0xff]  ;;  %v2722_v28 = vcombine.high %v112_v22, %v116_v23  ;;  %1703 = vmatprep.subr.bf16.mxu1 %v2858_v21  ;;  %v2721_v34 = vcombine.low %v112_v22, %v116_v23 }
  0x42   :  { %v244_v25 = vld [vmem:[#allocation4 + $0x520] sm:$0xff]  ;;  %1704 = vmatpush1.bf16.msra.mxu1 %v2857_v27 }
  0x43   :  { %v2850_v29 = vcombine.high %v240_v24, %v244_v25  ;;  %v104_v30 = vld [vmem:[#allocation4 + $0xc0] sm:$0xff]  ;;  %1664 = vmatprep.subr.bf16.mxu0 %v2722_v28  ;;  %v2849_v35 = vcombine.low %v240_v24, %v244_v25 }
  0x44   :  { %v108_v31 = vld [vmem:[#allocation4 + $0xe0] sm:$0xff]  ;;  %1665 = vmatpush1.bf16.msra.mxu0 %v2721_v34 }
  0x45   :  { %v232_v32 = vld [vmem:[#allocation4 + $0x4c0] sm:$0xff]  ;;  %v2714_v36 = vcombine.high %v104_v30, %v108_v31  ;;  %1705 = vmatprep.subr.bf16.mxu1 %v2850_v29  ;;  %v2713_v42 = vcombine.low %v104_v30, %v108_v31 }
  0x46   :  { %v236_v33 = vld [vmem:[#allocation4 + $0x4e0] sm:$0xff]  ;;  %1706 = vmatpush1.bf16.msra.mxu1 %v2849_v35 }
  0x47   :  { %v2842_v37 = vcombine.high %v232_v32, %v236_v33  ;;  %v96_v38 = vld [vmem:[#allocation4 + $0x80] sm:$0xff]  ;;  %1666 = vmatprep.subr.bf16.mxu0 %v2714_v36  ;;  %v2841_v43 = vcombine.low %v232_v32, %v236_v33 }
  0x48   :  { %v100_v39 = vld [vmem:[#allocation4 + $0xa0] sm:$0xff]  ;;  %1667 = vmatpush1.bf16.msra.mxu0 %v2713_v42 }
  0x49   :  { %v224_v40 = vld [vmem:[#allocation4 + $0x480] sm:$0xff]  ;;  %v2706_v44 = vcombine.high %v96_v38, %v100_v39  ;;  %1707 = vmatprep.subr.bf16.mxu1 %v2842_v37  ;;  %v2705_v50 = vcombine.low %v96_v38, %v100_v39 }
  0x4a   :  { %v228_v41 = vld [vmem:[#allocation4 + $0x4a0] sm:$0xff]  ;;  %1708 = vmatpush1.bf16.msra.mxu1 %v2841_v43 }
  0x4b   :  { %v2834_v45 = vcombine.high %v224_v40, %v228_v41  ;;  %v88_v46 = vld [vmem:[#allocation4 + $0x40] sm:$0xff]  ;;  %1668 = vmatprep.subr.bf16.mxu0 %v2706_v44  ;;  %v2833_v51 = vcombine.low %v224_v40, %v228_v41 }
  0x4c   :  { %v92_v47 = vld [vmem:[#allocation4 + $0x60] sm:$0xff]  ;;  %1669 = vmatpush1.bf16.msra.mxu0 %v2705_v50 }
  0x4d   :  { %v216_v48 = vld [vmem:[#allocation4 + $0x440] sm:$0xff]  ;;  %v2698_v52 = vcombine.high %v88_v46, %v92_v47  ;;  %1709 = vmatprep.subr.bf16.mxu1 %v2834_v45  ;;  %v2697_v62 = vcombine.low %v88_v46, %v92_v47 }
  0x4e   :  { %v220_v49 = vld [vmem:[#allocation4 + $0x460] sm:$0xff]  ;;  %1710 = vmatpush1.bf16.msra.mxu1 %v2833_v51 }
  0x4f   :  { %v2826_v55 = vcombine.high %v216_v48, %v220_v49  ;;  %v80_v56 = vld [vmem:[#allocation4] sm:$0xff]  ;;  %1670 = vmatprep.subr.bf16.mxu0 %v2698_v52  ;;  %v2825_v63 = vcombine.low %v216_v48, %v220_v49 }
  0x50   :  { %v84_v57 = vld [vmem:[#allocation4 + $0x20] sm:$0xff]  ;;  %1671 = vmatpush1.bf16.msra.mxu0 %v2697_v62 }
  0x51   :  { %v208_v60 = vld [vmem:[#allocation4 + $0x400] sm:$0xff]  ;;  %v2690_v0 = vcombine.high %v80_v56, %v84_v57  ;;  %1711 = vmatprep.subr.bf16.mxu1 %v2826_v55  ;;  %v2689_v6 = vcombine.low %v80_v56, %v84_v57 }
  0x52   :  { %v212_v61 = vld [vmem:[#allocation4 + $0x420] sm:$0xff]  ;;  %1712 = vmatpush1.bf16.msra.mxu1 %v2825_v63 }
  0x53   :  { %v2818_v1 = vcombine.high %v208_v60, %v212_v61  ;;  %v200_v2 = vld [vmem:[#allocation4 + $0x3c0] sm:$0xff]  ;;  %1672 = vmatprep.subr.bf16.mxu0 %v2690_v0  ;;  %v2817_v7 = vcombine.low %v208_v60, %v212_v61 }
  0x54   :  { %v204_v3 = vld [vmem:[#allocation4 + $0x3e0] sm:$0xff]  ;;  %1673 = vmatpush1.bf16.msra.mxu0 %v2689_v6  ;;  %v265_v6 = vld [vmem:[#allocation4 + $0x5c8] sm:$0xff] }
  0x55   :  { %v328_v4 = vld [vmem:[#allocation4 + $0x7c0] sm:$0xff]  ;;  %v2810_v8 = vcombine.high %v200_v2, %v204_v3  ;;  %1713 = vmatprep.subr.bf16.mxu1 %v2818_v1  ;;  %v2809_v14 = vcombine.low %v200_v2, %v204_v3 }
  0x56   :  { %v332_v5 = vld [vmem:[#allocation4 + $0x7e0] sm:$0xff]  ;;  %1714 = vmatpush1.bf16.msra.mxu1 %v2817_v7  ;;  %v269_v7 = vld [vmem:[#allocation4 + $0x5e8] sm:$0xff] }
  0x57   :  { %v2938_v9 = vcombine.high %v328_v4, %v332_v5  ;;  %v192_v10 = vld [vmem:[#allocation4 + $0x380] sm:$0xff]  ;;  %1674 = vmatprep.subr.bf16.mxu0 %v2810_v8  ;;  %v2937_v15 = vcombine.low %v328_v4, %v332_v5  ;;  %v137_v4 = vld [vmem:[#allocation4 + $0x1c8] sm:$0xff] }
  0x58   :  { %v196_v11 = vld [vmem:[#allocation4 + $0x3a0] sm:$0xff]  ;;  %1675 = vmatpush2.bf16.msra.mxu0 %v2809_v14  ;;  %v141_v5 = vld [vmem:[#allocation4 + $0x1e8] sm:$0xff] }
  0x59   :  { %v320_v12 = vld [vmem:[#allocation4 + $0x780] sm:$0xff]  ;;  %v2802_v16 = vcombine.high %v192_v10, %v196_v11  ;;  %1715 = vmatprep.subr.bf16.mxu1 %v2938_v9  ;;  %v2801_v22 = vcombine.low %v192_v10, %v196_v11  ;;  %v74_v11 = vld [vmem:[#allocation2 + $0x10] sm:$0xff]  ;;  %v129_v14 = vld [vmem:[#allocation4 + $0x188] sm:$0xff] }
  0x5a   :  { %v324_v13 = vld [vmem:[#allocation4 + $0x7a0] sm:$0xff]  ;;  %1716 = vmatpush2.bf16.msra.mxu1 %v2937_v15  ;;  %v133_v15 = vld [vmem:[#allocation4 + $0x1a8] sm:$0xff] }
  0x5b   :  { %v2930_v17 = vcombine.high %v320_v12, %v324_v13  ;;  %v184_v18 = vld [vmem:[#allocation4 + $0x340] sm:$0xff]  ;;  %1676 = vmatprep.subr.bf16.mxu0 %v2802_v16  ;;  %v2929_v23 = vcombine.low %v320_v12, %v324_v13  ;;  %v2748_v12 = vcombine.high %v137_v4, %v141_v5  ;;  %v2876_v13 = vcombine.high %v265_v6, %v269_v7 }
  0x5c   :  { %v188_v19 = vld [vmem:[#allocation4 + $0x360] sm:$0xff]  ;;  %1677 = vmatpush2.bf16.msra.mxu0 %v2801_v22  ;;  %v2740_v22 = vcombine.high %v129_v14, %v133_v15 }
  0x5d   :  { %v312_v20 = vld [vmem:[#allocation4 + $0x740] sm:$0xff]  ;;  %v2794_v24 = vcombine.high %v184_v18, %v188_v19  ;;  %1717 = vmatprep.subr.bf16.mxu1 %v2930_v17  ;;  %v2793_v30 = vcombine.low %v184_v18, %v188_v19  ;;  %v257_v17 = vld [vmem:[#allocation4 + $0x588] sm:$0xff]  ;;  %v3314_v19 = vpack.c.bf16 %v74_v11, %v74_v11 }
  0x5e   :  { %v316_v21 = vld [vmem:[#allocation4 + $0x760] sm:$0xff]  ;;  %1718 = vmatpush2.bf16.msra.mxu1 %v2929_v23  ;;  %v261_v18 = vld [vmem:[#allocation4 + $0x5a8] sm:$0xff] }
  0x5f   :  { %v2922_v25 = vcombine.high %v312_v20, %v316_v21  ;;  %v176_v26 = vld [vmem:[#allocation4 + $0x300] sm:$0xff]  ;;  %1678 = vmatprep.subr.bf16.mxu0 %v2794_v24  ;;  %v2921_v31 = vcombine.low %v312_v20, %v316_v21  ;;  %v2747_v20 = vcombine.low %v137_v4, %v141_v5  ;;  %v2875_v21 = vcombine.low %v265_v6, %v269_v7  ;;  %v121_v23 = vld [vmem:[#allocation4 + $0x148] sm:$0xff] }
  0x60   :  { %v180_v27 = vld [vmem:[#allocation4 + $0x320] sm:$0xff]  ;;  %1679 = vmatpush2.bf16.msra.mxu0 %v2793_v30  ;;  %v125_v24 = vld [vmem:[#allocation4 + $0x168] sm:$0xff] }
  0x61   :  { %v304_v28 = vld [vmem:[#allocation4 + $0x700] sm:$0xff]  ;;  %v2786_v32 = vcombine.high %v176_v26, %v180_v27  ;;  %1719 = vmatprep.subr.bf16.mxu1 %v2922_v25  ;;  %v2785_v38 = vcombine.low %v176_v26, %v180_v27  ;;  %v2868_v25 = vcombine.high %v257_v17, %v261_v18  ;;  %v249_v26 = vld [vmem:[#allocation4 + $0x548] sm:$0xff]  ;;  %v2732_v30 = vcombine.high %v121_v23, %v125_v24 }
  0x62   :  { %v308_v29 = vld [vmem:[#allocation4 + $0x720] sm:$0xff]  ;;  %1720 = vmatpush2.bf16.msra.mxu1 %v2921_v31  ;;  %v253_v27 = vld [vmem:[#allocation4 + $0x568] sm:$0xff] }
  0x63   :  { %v2914_v33 = vcombine.high %v304_v28, %v308_v29  ;;  %v168_v34 = vld [vmem:[#allocation4 + $0x2c0] sm:$0xff]  ;;  %1680 = vmatprep.subr.bf16.mxu0 %v2786_v32  ;;  %v2913_v39 = vcombine.low %v304_v28, %v308_v29  ;;  %v2739_v28 = vcombine.low %v129_v14, %v133_v15  ;;  %v2867_v29 = vcombine.low %v257_v17, %v261_v18  ;;  %v113_v31 = vld [vmem:[#allocation4 + $0x108] sm:$0xff] }
  0x64   :  { %v172_v35 = vld [vmem:[#allocation4 + $0x2e0] sm:$0xff]  ;;  %1681 = vmatpush2.bf16.msra.mxu0 %v2785_v38  ;;  %v117_v32 = vld [vmem:[#allocation4 + $0x128] sm:$0xff] }
  0x65   :  { %v296_v36 = vld [vmem:[#allocation4 + $0x6c0] sm:$0xff]  ;;  %v2778_v40 = vcombine.high %v168_v34, %v172_v35  ;;  %1721 = vmatprep.subr.bf16.mxu1 %v2914_v33  ;;  %v2777_v46 = vcombine.low %v168_v34, %v172_v35  ;;  %v241_v33 = vld [vmem:[#allocation4 + $0x508] sm:$0xff]  ;;  %v2860_v34 = vcombine.high %v249_v26, %v253_v27  ;;  %v2724_v38 = vcombine.high %v113_v31, %v117_v32 }
  0x66   :  { %v300_v37 = vld [vmem:[#allocation4 + $0x6e0] sm:$0xff]  ;;  %1722 = vmatpush2.bf16.msra.mxu1 %v2913_v39  ;;  %v245_v35 = vld [vmem:[#allocation4 + $0x528] sm:$0xff] }
  0x67   :  { %v2906_v41 = vcombine.high %v296_v36, %v300_v37  ;;  %v160_v42 = vld [vmem:[#allocation4 + $0x280] sm:$0xff]  ;;  %1682 = vmatprep.subr.bf16.mxu0 %v2778_v40  ;;  %v2905_v47 = vcombine.low %v296_v36, %v300_v37  ;;  %v2731_v36 = vcombine.low %v121_v23, %v125_v24  ;;  %v2859_v37 = vcombine.low %v249_v26, %v253_v27  ;;  %v105_v39 = vld [vmem:[#allocation4 + $0xc8] sm:$0xff] }
  0x68   :  { %v164_v43 = vld [vmem:[#allocation4 + $0x2a0] sm:$0xff]  ;;  %1683 = vmatpush2.bf16.msra.mxu0 %v2777_v46  ;;  %v109_v40 = vld [vmem:[#allocation4 + $0xe8] sm:$0xff] }
  0x69   :  { %v288_v44 = vld [vmem:[#allocation4 + $0x680] sm:$0xff]  ;;  %v2770_v48 = vcombine.high %v160_v42, %v164_v43  ;;  %1723 = vmatprep.subr.bf16.mxu1 %v2906_v41  ;;  %v2769_v54 = vcombine.low %v160_v42, %v164_v43  ;;  %v233_v41 = vld [vmem:[#allocation4 + $0x4c8] sm:$0xff]  ;;  %v2852_v42 = vcombine.high %v241_v33, %v245_v35  ;;  %v2716_v46 = vcombine.high %v105_v39, %v109_v40 }
  0x6a   :  { %v292_v45 = vld [vmem:[#allocation4 + $0x6a0] sm:$0xff]  ;;  %1724 = vmatpush2.bf16.msra.mxu1 %v2905_v47  ;;  %v237_v43 = vld [vmem:[#allocation4 + $0x4e8] sm:$0xff] }
  0x6b   :  { %v2898_v49 = vcombine.high %v288_v44, %v292_v45  ;;  %v152_v50 = vld [vmem:[#allocation4 + $0x240] sm:$0xff]  ;;  %1684 = vmatprep.subr.bf16.mxu0 %v2770_v48  ;;  %v2897_v55 = vcombine.low %v288_v44, %v292_v45  ;;  %v2723_v44 = vcombine.low %v113_v31, %v117_v32  ;;  %v2851_v45 = vcombine.low %v241_v33, %v245_v35  ;;  %v97_v47 = vld [vmem:[#allocation4 + $0x88] sm:$0xff] }
  0x6c   :  { %v156_v51 = vld [vmem:[#allocation4 + $0x260] sm:$0xff]  ;;  %1685 = vmatpush2.bf16.msra.mxu0 %v2769_v54  ;;  %v101_v48 = vld [vmem:[#allocation4 + $0xa8] sm:$0xff] }
  0x6d   :  { %v280_v52 = vld [vmem:[#allocation4 + $0x640] sm:$0xff]  ;;  %v2762_v56 = vcombine.high %v152_v50, %v156_v51  ;;  %1725 = vmatprep.subr.bf16.mxu1 %v2898_v49  ;;  %v2761_v0 = vcombine.low %v152_v50, %v156_v51  ;;  %v225_v49 = vld [vmem:[#allocation4 + $0x488] sm:$0xff]  ;;  %v2844_v50 = vcombine.high %v233_v41, %v237_v43  ;;  %v2708_v54 = vcombine.high %v97_v47, %v101_v48 }
  0x6e   :  { %v284_v53 = vld [vmem:[#allocation4 + $0x660] sm:$0xff]  ;;  %1726 = vmatpush2.bf16.msra.mxu1 %v2897_v55  ;;  %v229_v51 = vld [vmem:[#allocation4 + $0x4a8] sm:$0xff] }
  0x6f   :  { %v2890_v57 = vcombine.high %v280_v52, %v284_v53  ;;  %v144_v60 = vld [vmem:[#allocation4 + $0x200] sm:$0xff]  ;;  %1686 = vmatprep.subr.bf16.mxu0 %v2762_v56  ;;  %v2889_v1 = vcombine.low %v280_v52, %v284_v53  ;;  %v2715_v52 = vcombine.low %v105_v39, %v109_v40  ;;  %v2843_v53 = vcombine.low %v233_v41, %v237_v43  ;;  %v89_v55 = vld [vmem:[#allocation4 + $0x48] sm:$0xff] }
  0x70   :  { %v148_v61 = vld [vmem:[#allocation4 + $0x220] sm:$0xff]  ;;  %1687 = vmatpush2.bf16.msra.mxu0 %v2761_v0  ;;  %v93_v56 = vld [vmem:[#allocation4 + $0x68] sm:$0xff] }
  0x71   :  { %v272_v62 = vld [vmem:[#allocation4 + $0x600] sm:$0xff]  ;;  %v2754_v2 = vcombine.high %v144_v60, %v148_v61  ;;  %1727 = vmatprep.subr.bf16.mxu1 %v2890_v57  ;;  %v2753_v8 = vcombine.low %v144_v60, %v148_v61  ;;  %v217_v57 = vld [vmem:[#allocation4 + $0x448] sm:$0xff]  ;;  %v2836_v60 = vcombine.high %v225_v49, %v229_v51  ;;  %v2700_v0 = vcombine.high %v89_v55, %v93_v56 }
  0x72   :  { %v276_v63 = vld [vmem:[#allocation4 + $0x620] sm:$0xff]  ;;  %1728 = vmatpush2.bf16.msra.mxu1 %v2889_v1  ;;  %v221_v61 = vld [vmem:[#allocation4 + $0x468] sm:$0xff]  ;;  %v2699_v6 = vcombine.low %v89_v55, %v93_v56 }
  0x73   :  { %v2882_v3 = vcombine.high %v272_v62, %v276_v63  ;;  %v72_v9 = vld [vmem:[#allocation2] sm:$0xff]  ;;  %1688 = vmatprep.subr.bf16.mxu0 %v2754_v2  ;;  %v2881_v10 = vcombine.low %v272_v62, %v276_v63  ;;  %v2707_v62 = vcombine.low %v97_v47, %v101_v48  ;;  %v2835_v63 = vcombine.low %v225_v49, %v229_v51  ;;  %v81_v1 = vld [vmem:[#allocation4 + $0x8] sm:$0xff] }
  0x74   :  { %v3312_v16 = vpack.c.bf16 %v72_v9, %v72_v9  ;;  %1689 = vmatpush2.bf16.msra.mxu0 %v2753_v8  ;;  %v85_v2 = vld [vmem:[#allocation4 + $0x28] sm:$0xff]  ;;  %v2828_v4 = vcombine.high %v217_v57, %v221_v61  ;;  %v2827_v7 = vcombine.low %v217_v57, %v221_v61 }
  0x75   :  { %1729 = vmatprep.subr.bf16.mxu1 %v2882_v3  ;;  %1740 = vmatprep.subr.bf16.mxu0 %v2748_v12  ;;  %v209_v3 = vld [vmem:[#allocation4 + $0x408] sm:$0xff]  ;;  %v2692_v8 = vcombine.high %v81_v1, %v85_v2  ;;  %v2691_v14 = vcombine.low %v81_v1, %v85_v2 }
  0x76   :  { %1730 = vmatpush2.bf16.msra.mxu1 %v2881_v10  ;;  %v213_v5 = vld [vmem:[#allocation4 + $0x428] sm:$0xff] }
  0x77   :  { %1781 = vmatprep.subr.bf16.mxu1 %v2876_v13  ;;  %1691 = vmatmul.mubr.bf16.vlgmr.msra.gmra.mxu0 %v3312_v16  ;;  %v201_v9 = vld [vmem:[#allocation4 + $0x3c8] sm:$0xff]  ;;  %v2820_v12 = vcombine.high %v209_v3, %v213_v5  ;;  %v2819_v15 = vcombine.low %v209_v3, %v213_v5 }
  0x78   :  { %1741 = vmatpush1.bf16.msra.mxu0 %v2747_v20  ;;  %1772 = vmatprep.mubr.bf16.mxu0 %v3306_v58  ;;  %v205_v10 = vld [vmem:[#allocation4 + $0x3e8] sm:$0xff] }
  0x79   :  { %1732 = vmatmul.mubr.bf16.vlgmr.msra.gmra.mxu1 %v3314_v19  ;;  %1742 = vmatprep.subr.bf16.mxu0 %v2740_v22  ;;  %v329_v11 = vld [vmem:[#allocation4 + $0x7c8] sm:$0xff]  ;;  %v2812_v17 = vcombine.high %v201_v9, %v205_v10  ;;  %v2811_v24 = vcombine.low %v201_v9, %v205_v10 }
  0x7a   :  { %1782 = vmatpush1.bf16.msra.mxu1 %v2875_v21  ;;  %1813 = vmatprep.mubr.bf16.mxu1 %v3308_v59  ;;  %v333_v13 = vld [vmem:[#allocation4 + $0x7e8] sm:$0xff] }
  0x7b   :  { %1783 = vmatprep.subr.bf16.mxu1 %v2868_v25  ;;  %v193_v18 = vld [vmem:[#allocation4 + $0x388] sm:$0xff]  ;;  %v2940_v22 = vcombine.high %v329_v11, %v333_v13  ;;  %v2939_v25 = vcombine.low %v329_v11, %v333_v13  ;;  %v138_v13 = vld [vmem:[#allocation4 + $0x1d0] sm:$0xff] }
  0x7c   :  { %1743 = vmatpush1.bf16.msra.mxu0 %v2739_v28  ;;  %v197_v20 = vld [vmem:[#allocation4 + $0x3a8] sm:$0xff] }
  0x7d   :  { %1744 = vmatprep.subr.bf16.mxu0 %v2732_v30  ;;  %v321_v21 = vld [vmem:[#allocation4 + $0x788] sm:$0xff]  ;;  %v2804_v26 = vcombine.high %v193_v18, %v197_v20  ;;  %v2803_v32 = vcombine.low %v193_v18, %v197_v20  ;;  %v270_v18 = vld [vmem:[#allocation4 + $0x5f0] sm:$0xff] }
  0x7e   :  { %1784 = vmatpush1.bf16.msra.mxu1 %v2867_v29  ;;  %v325_v23 = vld [vmem:[#allocation4 + $0x7a8] sm:$0xff] }
  0x7f   :  { %1785 = vmatprep.subr.bf16.mxu1 %v2860_v34  ;;  %v185_v27 = vld [vmem:[#allocation4 + $0x348] sm:$0xff]  ;;  %v2932_v30 = vcombine.high %v321_v21, %v325_v23  ;;  %v2931_v33 = vcombine.low %v321_v21, %v325_v23  ;;  %v130_v23 = vld [vmem:[#allocation4 + $0x190] sm:$0xff] }
  0x80   :  { %1745 = vmatpush1.bf16.msra.mxu0 %v2731_v36  ;;  %v189_v28 = vld [vmem:[#allocation4 + $0x368] sm:$0xff] }
  0x81   :  { %1746 = vmatprep.subr.bf16.mxu0 %v2724_v38  ;;  %v313_v29 = vld [vmem:[#allocation4 + $0x748] sm:$0xff]  ;;  %v2796_v34 = vcombine.high %v185_v27, %v189_v28  ;;  %v2795_v40 = vcombine.low %v185_v27, %v189_v28  ;;  %v262_v27 = vld [vmem:[#allocation4 + $0x5b0] sm:$0xff] }
  0x82   :  { %1786 = vmatpush1.bf16.msra.mxu1 %v2859_v37  ;;  %v317_v31 = vld [vmem:[#allocation4 + $0x768] sm:$0xff] }
  0x83   :  { %1787 = vmatprep.subr.bf16.mxu1 %v2852_v42  ;;  %v177_v35 = vld [vmem:[#allocation4 + $0x308] sm:$0xff]  ;;  %v2924_v38 = vcombine.high %v313_v29, %v317_v31  ;;  %v2923_v41 = vcombine.low %v313_v29, %v317_v31 }
  0x84   :  { %1747 = vmatpush1.bf16.msra.mxu0 %v2723_v44  ;;  %v181_v36 = vld [vmem:[#allocation4 + $0x328] sm:$0xff] }
  0x85   :  { %1748 = vmatprep.subr.bf16.mxu0 %v2716_v46  ;;  %v305_v37 = vld [vmem:[#allocation4 + $0x708] sm:$0xff]  ;;  %v2788_v42 = vcombine.high %v177_v35, %v181_v36  ;;  %v2787_v48 = vcombine.low %v177_v35, %v181_v36  ;;  %v254_v35 = vld [vmem:[#allocation4 + $0x570] sm:$0xff] }
  0x86   :  { %1788 = vmatpush1.bf16.msra.mxu1 %v2851_v45  ;;  %v309_v39 = vld [vmem:[#allocation4 + $0x728] sm:$0xff] }
  0x87   :  { %1789 = vmatprep.subr.bf16.mxu1 %v2844_v50  ;;  %v169_v43 = vld [vmem:[#allocation4 + $0x2c8] sm:$0xff]  ;;  %v2916_v46 = vcombine.high %v305_v37, %v309_v39  ;;  %v2915_v49 = vcombine.low %v305_v37, %v309_v39 }
  0x88   :  { %1749 = vmatpush1.bf16.msra.mxu0 %v2715_v52  ;;  %v173_v44 = vld [vmem:[#allocation4 + $0x2e8] sm:$0xff] }
  0x89   :  { %1750 = vmatprep.subr.bf16.mxu0 %v2708_v54  ;;  %v297_v45 = vld [vmem:[#allocation4 + $0x6c8] sm:$0xff]  ;;  %v2780_v50 = vcombine.high %v169_v43, %v173_v44  ;;  %v2779_v56 = vcombine.low %v169_v43, %v173_v44  ;;  %v246_v43 = vld [vmem:[#allocation4 + $0x530] sm:$0xff] }
  0x8a   :  { %1790 = vmatpush1.bf16.msra.mxu1 %v2843_v53  ;;  %v301_v47 = vld [vmem:[#allocation4 + $0x6e8] sm:$0xff] }
  0x8b   :  { %1791 = vmatprep.subr.bf16.mxu1 %v2836_v60  ;;  %v161_v51 = vld [vmem:[#allocation4 + $0x288] sm:$0xff]  ;;  %v2908_v54 = vcombine.high %v297_v45, %v301_v47  ;;  %v2907_v57 = vcombine.low %v297_v45, %v301_v47 }
  0x8c   :  { %1751 = vmatpush1.bf16.msra.mxu0 %v2707_v62  ;;  %v165_v52 = vld [vmem:[#allocation4 + $0x2a8] sm:$0xff] }
  0x8d   :  { %1752 = vmatprep.subr.bf16.mxu0 %v2700_v0  ;;  %v289_v53 = vld [vmem:[#allocation4 + $0x688] sm:$0xff]  ;;  %v2772_v60 = vcombine.high %v161_v51, %v165_v52  ;;  %v2771_v2 = vcombine.low %v161_v51, %v165_v52  ;;  %v238_v51 = vld [vmem:[#allocation4 + $0x4f0] sm:$0xff] }
  0x8e   :  { %1792 = vmatpush1.bf16.msra.mxu1 %v2835_v63  ;;  %v293_v55 = vld [vmem:[#allocation4 + $0x6a8] sm:$0xff] }
  0x8f   :  { %1793 = vmatprep.subr.bf16.mxu1 %v2828_v4  ;;  %v153_v61 = vld [vmem:[#allocation4 + $0x248] sm:$0xff]  ;;  %v2900_v0 = vcombine.high %v289_v53, %v293_v55  ;;  %v2899_v3 = vcombine.low %v289_v53, %v293_v55 }
  0x90   :  { %1753 = vmatpush1.bf16.msra.mxu0 %v2699_v6  ;;  %v157_v62 = vld [vmem:[#allocation4 + $0x268] sm:$0xff] }
  0x91   :  { %1754 = vmatprep.subr.bf16.mxu0 %v2692_v8  ;;  %v281_v63 = vld [vmem:[#allocation4 + $0x648] sm:$0xff]  ;;  %v2764_v4 = vcombine.high %v153_v61, %v157_v62  ;;  %v2763_v10 = vcombine.low %v153_v61, %v157_v62  ;;  %v230_v61 = vld [vmem:[#allocation4 + $0x4b0] sm:$0xff] }
  0x92   :  { %1794 = vmatpush1.bf16.msra.mxu1 %v2827_v7  ;;  %v285_v1 = vld [vmem:[#allocation4 + $0x668] sm:$0xff] }
  0x93   :  { %1795 = vmatprep.subr.bf16.mxu1 %v2820_v12  ;;  %v145_v5 = vld [vmem:[#allocation4 + $0x208] sm:$0xff]  ;;  %v2892_v8 = vcombine.high %v281_v63, %v285_v1  ;;  %v2891_v11 = vcombine.low %v281_v63, %v285_v1 }
  0x94   :  { %1755 = vmatpush1.bf16.msra.mxu0 %v2691_v14  ;;  %v149_v6 = vld [vmem:[#allocation4 + $0x228] sm:$0xff]  ;;  %v142_v14 = vld [vmem:[#allocation4 + $0x1f0] sm:$0xff] }
  0x95   :  { %1756 = vmatprep.subr.bf16.mxu0 %v2812_v17  ;;  %v273_v7 = vld [vmem:[#allocation4 + $0x608] sm:$0xff]  ;;  %v2756_v12 = vcombine.high %v145_v5, %v149_v6  ;;  %v2755_v20 = vcombine.low %v145_v5, %v149_v6  ;;  %v2749_v28 = vcombine.low %v138_v13, %v142_v14  ;;  %v222_v5 = vld [vmem:[#allocation4 + $0x470] sm:$0xff] }
  0x96   :  { %1796 = vmatpush1.bf16.msra.mxu1 %v2819_v15  ;;  %v277_v9 = vld [vmem:[#allocation4 + $0x628] sm:$0xff]  ;;  %v266_v15 = vld [vmem:[#allocation4 + $0x5d0] sm:$0xff] }
  0x97   :  { %1797 = vmatprep.subr.bf16.mxu1 %v2940_v22  ;;  %v2884_v17 = vcombine.high %v273_v7, %v277_v9  ;;  %v2883_v21 = vcombine.low %v273_v7, %v277_v9  ;;  %v2750_v22 = vcombine.high %v138_v13, %v142_v14  ;;  %v2877_v29 = vcombine.low %v266_v15, %v270_v18  ;;  %v214_v13 = vld [vmem:[#allocation4 + $0x430] sm:$0xff] }
  0x98   :  { %1757 = vmatpush2.bf16.msra.mxu0 %v2811_v24  ;;  %v134_v24 = vld [vmem:[#allocation4 + $0x1b0] sm:$0xff] }
  0x99   :  { %1758 = vmatprep.subr.bf16.mxu0 %v2804_v26  ;;  %v2878_v26 = vcombine.high %v266_v15, %v270_v18  ;;  %v2741_v36 = vcombine.low %v130_v23, %v134_v24 }
  0x9a   :  { %1798 = vmatpush2.bf16.msra.mxu1 %v2939_v25  ;;  %v258_v25 = vld [vmem:[#allocation4 + $0x590] sm:$0xff] }
  0x9b   :  { %1799 = vmatprep.subr.bf16.mxu1 %v2932_v30  ;;  %v2742_v30 = vcombine.high %v130_v23, %v134_v24  ;;  %v2870_v31 = vcombine.high %v258_v25, %v262_v27  ;;  %v2869_v37 = vcombine.low %v258_v25, %v262_v27  ;;  %v334_v23 = vld [vmem:[#allocation4 + $0x7f0] sm:$0xff] }
  0x9c   :  { %1759 = vmatpush2.bf16.msra.mxu0 %v2803_v32  ;;  %v122_v32 = vld [vmem:[#allocation4 + $0x150] sm:$0xff] }
  0x9d   :  { %1760 = vmatprep.subr.bf16.mxu0 %v2796_v34  ;;  %v250_v34 = vld [vmem:[#allocation4 + $0x550] sm:$0xff] }
  0x9e   :  { %1800 = vmatpush2.bf16.msra.mxu1 %v2931_v33  ;;  %v126_v33 = vld [vmem:[#allocation4 + $0x170] sm:$0xff]  ;;  %v2862_v39 = vcombine.high %v250_v34, %v254_v35  ;;  %v2861_v45 = vcombine.low %v250_v34, %v254_v35 }
  0x9f   :  { %1801 = vmatprep.subr.bf16.mxu1 %v2924_v38  ;;  %v2734_v38 = vcombine.high %v122_v32, %v126_v33  ;;  %v2733_v44 = vcombine.low %v122_v32, %v126_v33 }
  0xa0   :  { %1761 = vmatpush2.bf16.msra.mxu0 %v2795_v40  ;;  %v114_v40 = vld [vmem:[#allocation4 + $0x110] sm:$0xff] }
  0xa1   :  { %1762 = vmatprep.subr.bf16.mxu0 %v2788_v42  ;;  %v242_v42 = vld [vmem:[#allocation4 + $0x510] sm:$0xff] }
  0xa2   :  { %1802 = vmatpush2.bf16.msra.mxu1 %v2923_v41  ;;  %v118_v41 = vld [vmem:[#allocation4 + $0x130] sm:$0xff]  ;;  %v2854_v47 = vcombine.high %v242_v42, %v246_v43  ;;  %v2853_v53 = vcombine.low %v242_v42, %v246_v43 }
  0xa3   :  { %1803 = vmatprep.subr.bf16.mxu1 %v2916_v46  ;;  %v2726_v46 = vcombine.high %v114_v40, %v118_v41  ;;  %v2725_v52 = vcombine.low %v114_v40, %v118_v41 }
  0xa4   :  { %1763 = vmatpush2.bf16.msra.mxu0 %v2787_v48  ;;  %v106_v48 = vld [vmem:[#allocation4 + $0xd0] sm:$0xff] }
  0xa5   :  { %1764 = vmatprep.subr.bf16.mxu0 %v2780_v50  ;;  %v234_v50 = vld [vmem:[#allocation4 + $0x4d0] sm:$0xff] }
  0xa6   :  { %1804 = vmatpush2.bf16.msra.mxu1 %v2915_v49  ;;  %v110_v49 = vld [vmem:[#allocation4 + $0xf0] sm:$0xff]  ;;  %v2846_v55 = vcombine.high %v234_v50, %v238_v51  ;;  %v2845_v63 = vcombine.low %v234_v50, %v238_v51 }
  0xa7   :  { %1805 = vmatprep.subr.bf16.mxu1 %v2908_v54  ;;  %v2718_v54 = vcombine.high %v106_v48, %v110_v49  ;;  %v2717_v62 = vcombine.low %v106_v48, %v110_v49 }
  0xa8   :  { %1765 = vmatpush2.bf16.msra.mxu0 %v2779_v56  ;;  %v98_v56 = vld [vmem:[#allocation4 + $0x90] sm:$0xff] }
  0xa9   :  { %1766 = vmatprep.subr.bf16.mxu0 %v2772_v60  ;;  %v226_v60 = vld [vmem:[#allocation4 + $0x490] sm:$0xff] }
  0xaa   :  { %1806 = vmatpush2.bf16.msra.mxu1 %v2907_v57  ;;  %v102_v57 = vld [vmem:[#allocation4 + $0xb0] sm:$0xff]  ;;  %v2838_v1 = vcombine.high %v226_v60, %v230_v61  ;;  %v2837_v7 = vcombine.low %v226_v60, %v230_v61 }
  0xab   :  { %1807 = vmatprep.subr.bf16.mxu1 %v2900_v0  ;;  %v2710_v0 = vcombine.high %v98_v56, %v102_v57  ;;  %v2709_v6 = vcombine.low %v98_v56, %v102_v57 }
  0xac   :  { %1767 = vmatpush2.bf16.msra.mxu0 %v2771_v2  ;;  %v90_v2 = vld [vmem:[#allocation4 + $0x50] sm:$0xff] }
  0xad   :  { %1768 = vmatprep.subr.bf16.mxu0 %v2764_v4  ;;  %v218_v4 = vld [vmem:[#allocation4 + $0x450] sm:$0xff] }
  0xae   :  { %1808 = vmatpush2.bf16.msra.mxu1 %v2899_v3  ;;  %v94_v3 = vld [vmem:[#allocation4 + $0x70] sm:$0xff]  ;;  %v2830_v9 = vcombine.high %v218_v4, %v222_v5  ;;  %v2829_v15 = vcombine.low %v218_v4, %v222_v5 }
  0xaf   :  { %1809 = vmatprep.subr.bf16.mxu1 %v2892_v8  ;;  %v2702_v8 = vcombine.high %v90_v2, %v94_v3  ;;  %v2701_v14 = vcombine.low %v90_v2, %v94_v3 }
  0xb0   :  { %1769 = vmatpush2.bf16.msra.mxu0 %v2763_v10  ;;  %v82_v10 = vld [vmem:[#allocation4 + $0x10] sm:$0xff] }
  0xb1   :  { %1770 = vmatprep.subr.bf16.mxu0 %v2756_v12  ;;  %v210_v12 = vld [vmem:[#allocation4 + $0x410] sm:$0xff] }
  0xb2   :  { %1810 = vmatpush2.bf16.msra.mxu1 %v2891_v11  ;;  %v86_v11 = vld [vmem:[#allocation4 + $0x30] sm:$0xff]  ;;  %v2822_v18 = vcombine.high %v210_v12, %v214_v13  ;;  %v2821_v25 = vcombine.low %v210_v12, %v214_v13 }
  0xb3   :  { %1811 = vmatprep.subr.bf16.mxu1 %v2884_v17  ;;  %v2694_v17 = vcombine.high %v82_v10, %v86_v11  ;;  %v2693_v24 = vcombine.low %v82_v10, %v86_v11 }
  0xb4   :  { %1771 = vmatpush2.bf16.msra.mxu0 %v2755_v20  ;;  %v202_v20 = vld [vmem:[#allocation4 + $0x3d0] sm:$0xff] }
  0xb5   :  { %1822 = vmatprep.subr.bf16.mxu0 %v2750_v22  ;;  %v330_v22 = vld [vmem:[#allocation4 + $0x7d0] sm:$0xff] }
  0xb6   :  { %1812 = vmatpush2.bf16.msra.mxu1 %v2883_v21  ;;  %v206_v21 = vld [vmem:[#allocation4 + $0x3f0] sm:$0xff]  ;;  %v2942_v27 = vcombine.high %v330_v22, %v334_v23  ;;  %v2941_v33 = vcombine.low %v330_v22, %v334_v23 }
  0xb7   :  { %1863 = vmatprep.subr.bf16.mxu1 %v2878_v26  ;;  %1773 = vmatmul.mubr.bf16.vlgmr.msra.gmra.mxu0 %v3312_v16  ;;  %v2814_v26 = vcombine.high %v202_v20, %v206_v21  ;;  %v2813_v32 = vcombine.low %v202_v20, %v206_v21 }
  0xb8   :  { %1823 = vmatpush1.bf16.msra.mxu0 %v2749_v28  ;;  %1854 = vmatprep.mubr.bf16.mxu0 %v3306_v58  ;;  %v194_v28 = vld [vmem:[#allocation4 + $0x390] sm:$0xff] }
  0xb9   :  { %1814 = vmatmul.mubr.bf16.vlgmr.msra.gmra.mxu1 %v3314_v19  ;;  %1824 = vmatprep.subr.bf16.mxu0 %v2742_v30  ;;  %v322_v30 = vld [vmem:[#allocation4 + $0x790] sm:$0xff] }
  0xba   :  { %1864 = vmatpush1.bf16.msra.mxu1 %v2877_v29  ;;  %1895 = vmatprep.mubr.bf16.mxu1 %v3308_v59  ;;  %v198_v29 = vld [vmem:[#allocation4 + $0x3b0] sm:$0xff] }
  0xbb   :  { %1865 = vmatprep.subr.bf16.mxu1 %v2870_v31  ;;  %v326_v31 = vld [vmem:[#allocation4 + $0x7b0] sm:$0xff]  ;;  %v2806_v34 = vcombine.high %v194_v28, %v198_v29  ;;  %v2805_v40 = vcombine.low %v194_v28, %v198_v29 }
  0xbc   :  { %1825 = vmatpush1.bf16.msra.mxu0 %v2741_v36  ;;  %v2934_v35 = vcombine.high %v322_v30, %v326_v31  ;;  %v186_v36 = vld [vmem:[#allocation4 + $0x350] sm:$0xff]  ;;  %v2933_v41 = vcombine.low %v322_v30, %v326_v31 }
  0xbd   :  { %1826 = vmatprep.subr.bf16.mxu0 %v2734_v38  ;;  %v314_v38 = vld [vmem:[#allocation4 + $0x750] sm:$0xff] }
  0xbe   :  { %1866 = vmatpush1.bf16.msra.mxu1 %v2869_v37  ;;  %v190_v37 = vld [vmem:[#allocation4 + $0x370] sm:$0xff] }
  0xbf   :  { %1867 = vmatprep.subr.bf16.mxu1 %v2862_v39  ;;  %v318_v39 = vld [vmem:[#allocation4 + $0x770] sm:$0xff]  ;;  %v2798_v42 = vcombine.high %v186_v36, %v190_v37  ;;  %v2797_v48 = vcombine.low %v186_v36, %v190_v37 }
  0xc0   :  { %1827 = vmatpush1.bf16.msra.mxu0 %v2733_v44  ;;  %v2926_v43 = vcombine.high %v314_v38, %v318_v39  ;;  %v178_v44 = vld [vmem:[#allocation4 + $0x310] sm:$0xff]  ;;  %v2925_v49 = vcombine.low %v314_v38, %v318_v39 }
  0xc1   :  { %1828 = vmatprep.subr.bf16.mxu0 %v2726_v46  ;;  %v306_v46 = vld [vmem:[#allocation4 + $0x710] sm:$0xff] }
  0xc2   :  { %1868 = vmatpush1.bf16.msra.mxu1 %v2861_v45  ;;  %v182_v45 = vld [vmem:[#allocation4 + $0x330] sm:$0xff] }
  0xc3   :  { %1869 = vmatprep.subr.bf16.mxu1 %v2854_v47  ;;  %v310_v47 = vld [vmem:[#allocation4 + $0x730] sm:$0xff]  ;;  %v2790_v50 = vcombine.high %v178_v44, %v182_v45  ;;  %v2789_v56 = vcombine.low %v178_v44, %v182_v45 }
  0xc4   :  { %1829 = vmatpush1.bf16.msra.mxu0 %v2725_v52  ;;  %v2918_v51 = vcombine.high %v306_v46, %v310_v47  ;;  %v170_v52 = vld [vmem:[#allocation4 + $0x2d0] sm:$0xff]  ;;  %v2917_v57 = vcombine.low %v306_v46, %v310_v47 }
  0xc5   :  { %1830 = vmatprep.subr.bf16.mxu0 %v2718_v54  ;;  %v298_v54 = vld [vmem:[#allocation4 + $0x6d0] sm:$0xff] }
  0xc6   :  { %1870 = vmatpush1.bf16.msra.mxu1 %v2853_v53  ;;  %v174_v53 = vld [vmem:[#allocation4 + $0x2f0] sm:$0xff] }
  0xc7   :  { %1871 = vmatprep.subr.bf16.mxu1 %v2846_v55  ;;  %v302_v55 = vld [vmem:[#allocation4 + $0x6f0] sm:$0xff]  ;;  %v2782_v60 = vcombine.high %v170_v52, %v174_v53  ;;  %v2781_v2 = vcombine.low %v170_v52, %v174_v53 }
  0xc8   :  { %1831 = vmatpush1.bf16.msra.mxu0 %v2717_v62  ;;  %v2910_v61 = vcombine.high %v298_v54, %v302_v55  ;;  %v162_v62 = vld [vmem:[#allocation4 + $0x290] sm:$0xff]  ;;  %v2909_v3 = vcombine.low %v298_v54, %v302_v55 }
  0xc9   :  { %1832 = vmatprep.subr.bf16.mxu0 %v2710_v0  ;;  %v290_v0 = vld [vmem:[#allocation4 + $0x690] sm:$0xff] }
  0xca   :  { %1872 = vmatpush1.bf16.msra.mxu1 %v2845_v63  ;;  %v166_v63 = vld [vmem:[#allocation4 + $0x2b0] sm:$0xff] }
  0xcb   :  { %1873 = vmatprep.subr.bf16.mxu1 %v2838_v1  ;;  %v294_v1 = vld [vmem:[#allocation4 + $0x6b0] sm:$0xff]  ;;  %v2774_v4 = vcombine.high %v162_v62, %v166_v63  ;;  %v2773_v10 = vcombine.low %v162_v62, %v166_v63 }
  0xcc   :  { %1833 = vmatpush1.bf16.msra.mxu0 %v2709_v6  ;;  %v2902_v5 = vcombine.high %v290_v0, %v294_v1  ;;  %v154_v6 = vld [vmem:[#allocation4 + $0x250] sm:$0xff]  ;;  %v2901_v11 = vcombine.low %v290_v0, %v294_v1  ;;  %v99_v0 = vld [vmem:[#allocation4 + $0x98] sm:$0xff] }
  0xcd   :  { %1834 = vmatprep.subr.bf16.mxu0 %v2702_v8  ;;  %v282_v8 = vld [vmem:[#allocation4 + $0x650] sm:$0xff]  ;;  %v103_v1 = vld [vmem:[#allocation4 + $0xb8] sm:$0xff] }
  0xce   :  { %1874 = vmatpush1.bf16.msra.mxu1 %v2837_v7  ;;  %v158_v7 = vld [vmem:[#allocation4 + $0x270] sm:$0xff] }
  0xcf   :  { %1875 = vmatprep.subr.bf16.mxu1 %v2830_v9  ;;  %v286_v9 = vld [vmem:[#allocation4 + $0x670] sm:$0xff]  ;;  %v2766_v12 = vcombine.high %v154_v6, %v158_v7  ;;  %v2765_v20 = vcombine.low %v154_v6, %v158_v7  ;;  %v2712_v6 = vcombine.high %v99_v0, %v103_v1 }
  0xd0   :  { %1835 = vmatpush1.bf16.msra.mxu0 %v2701_v14  ;;  %v2894_v13 = vcombine.high %v282_v8, %v286_v9  ;;  %v146_v14 = vld [vmem:[#allocation4 + $0x210] sm:$0xff]  ;;  %v2893_v21 = vcombine.low %v282_v8, %v286_v9  ;;  %v91_v8 = vld [vmem:[#allocation4 + $0x58] sm:$0xff] }
  0xd1   :  { %1836 = vmatprep.subr.bf16.mxu0 %v2694_v17  ;;  %v274_v17 = vld [vmem:[#allocation4 + $0x610] sm:$0xff]  ;;  %v95_v9 = vld [vmem:[#allocation4 + $0x78] sm:$0xff] }
  0xd2   :  { %1876 = vmatpush1.bf16.msra.mxu1 %v2829_v15  ;;  %v150_v15 = vld [vmem:[#allocation4 + $0x230] sm:$0xff] }
  0xd3   :  { %1877 = vmatprep.subr.bf16.mxu1 %v2822_v18  ;;  %v278_v18 = vld [vmem:[#allocation4 + $0x630] sm:$0xff]  ;;  %v2758_v22 = vcombine.high %v146_v14, %v150_v15  ;;  %v2757_v28 = vcombine.low %v146_v14, %v150_v15  ;;  %v2704_v14 = vcombine.high %v91_v8, %v95_v9 }
  0xd4   :  { %1837 = vmatpush1.bf16.msra.mxu0 %v2693_v24  ;;  %v2886_v23 = vcombine.high %v274_v17, %v278_v18  ;;  %v139_v24 = vld [vmem:[#allocation4 + $0x1d8] sm:$0xff]  ;;  %v2885_v29 = vcombine.low %v274_v17, %v278_v18 }
  0xd5   :  { %1838 = vmatprep.subr.bf16.mxu0 %v2814_v26  ;;  %v267_v26 = vld [vmem:[#allocation4 + $0x5d8] sm:$0xff] }
  0xd6   :  { %1878 = vmatpush1.bf16.msra.mxu1 %v2821_v25  ;;  %v143_v25 = vld [vmem:[#allocation4 + $0x1f8] sm:$0xff] }
  0xd7   :  { %1879 = vmatprep.subr.bf16.mxu1 %v2942_v27  ;;  %v271_v27 = vld [vmem:[#allocation4 + $0x5f8] sm:$0xff]  ;;  %v2752_v30 = vcombine.high %v139_v24, %v143_v25  ;;  %v2751_v36 = vcombine.low %v139_v24, %v143_v25 }
  0xd8   :  { %1839 = vmatpush2.bf16.msra.mxu0 %v2813_v32  ;;  %v2880_v31 = vcombine.high %v267_v26, %v271_v27  ;;  %v131_v32 = vld [vmem:[#allocation4 + $0x198] sm:$0xff]  ;;  %v2879_v37 = vcombine.low %v267_v26, %v271_v27 }
  0xd9   :  { %1840 = vmatprep.subr.bf16.mxu0 %v2806_v34  ;;  %v259_v34 = vld [vmem:[#allocation4 + $0x598] sm:$0xff] }
  0xda   :  { %1880 = vmatpush2.bf16.msra.mxu1 %v2941_v33  ;;  %v135_v33 = vld [vmem:[#allocation4 + $0x1b8] sm:$0xff] }
  0xdb   :  { %1881 = vmatprep.subr.bf16.mxu1 %v2934_v35  ;;  %v263_v35 = vld [vmem:[#allocation4 + $0x5b8] sm:$0xff]  ;;  %v2744_v38 = vcombine.high %v131_v32, %v135_v33  ;;  %v2743_v44 = vcombine.low %v131_v32, %v135_v33 }
  0xdc   :  { %1841 = vmatpush2.bf16.msra.mxu0 %v2805_v40  ;;  %v2872_v39 = vcombine.high %v259_v34, %v263_v35  ;;  %v123_v40 = vld [vmem:[#allocation4 + $0x158] sm:$0xff]  ;;  %v2871_v45 = vcombine.low %v259_v34, %v263_v35 }
  0xdd   :  { %1842 = vmatprep.subr.bf16.mxu0 %v2798_v42  ;;  %v251_v42 = vld [vmem:[#allocation4 + $0x558] sm:$0xff] }
  0xde   :  { %1882 = vmatpush2.bf16.msra.mxu1 %v2933_v41  ;;  %v127_v41 = vld [vmem:[#allocation4 + $0x178] sm:$0xff] }
  0xdf   :  { %1883 = vmatprep.subr.bf16.mxu1 %v2926_v43  ;;  %v255_v43 = vld [vmem:[#allocation4 + $0x578] sm:$0xff]  ;;  %v2736_v46 = vcombine.high %v123_v40, %v127_v41  ;;  %v2735_v52 = vcombine.low %v123_v40, %v127_v41 }
  0xe0   :  { %1843 = vmatpush2.bf16.msra.mxu0 %v2797_v48  ;;  %v2864_v47 = vcombine.high %v251_v42, %v255_v43  ;;  %v115_v48 = vld [vmem:[#allocation4 + $0x118] sm:$0xff]  ;;  %v2863_v53 = vcombine.low %v251_v42, %v255_v43 }
  0xe1   :  { %1844 = vmatprep.subr.bf16.mxu0 %v2790_v50  ;;  %v243_v50 = vld [vmem:[#allocation4 + $0x518] sm:$0xff] }
  0xe2   :  { %1884 = vmatpush2.bf16.msra.mxu1 %v2925_v49  ;;  %v119_v49 = vld [vmem:[#allocation4 + $0x138] sm:$0xff] }
  0xe3   :  { %1885 = vmatprep.subr.bf16.mxu1 %v2918_v51  ;;  %v247_v51 = vld [vmem:[#allocation4 + $0x538] sm:$0xff]  ;;  %v2728_v54 = vcombine.high %v115_v48, %v119_v49  ;;  %v2727_v62 = vcombine.low %v115_v48, %v119_v49 }
  0xe4   :  { %1845 = vmatpush2.bf16.msra.mxu0 %v2789_v56  ;;  %v2856_v55 = vcombine.high %v243_v50, %v247_v51  ;;  %v107_v56 = vld [vmem:[#allocation4 + $0xd8] sm:$0xff] }
  0xe5   :  { %1846 = vmatprep.subr.bf16.mxu0 %v2782_v60  ;;  %v235_v60 = vld [vmem:[#allocation4 + $0x4d8] sm:$0xff] }
  0xe6   :  { %1886 = vmatpush2.bf16.msra.mxu1 %v2917_v57  ;;  %v111_v57 = vld [vmem:[#allocation4 + $0xf8] sm:$0xff] }
  0xe7   :  { %1887 = vmatprep.subr.bf16.mxu1 %v2910_v61  ;;  %v239_v61 = vld [vmem:[#allocation4 + $0x4f8] sm:$0xff]  ;;  %v2720_v63 = vcombine.high %v107_v56, %v111_v57 }
  0xe8   :  { %1847 = vmatpush2.bf16.msra.mxu0 %v2781_v2  ;;  %v227_v2 = vld [vmem:[#allocation4 + $0x498] sm:$0xff] }
  0xe9   :  { %1848 = vmatprep.subr.bf16.mxu0 %v2774_v4  ;;  %v2719_v4 = vcombine.low %v107_v56, %v111_v57  ;;  %v83_v17 = vld [vmem:[#allocation4 + $0x18] sm:$0xff] }
  0xea   :  { %1888 = vmatpush2.bf16.msra.mxu1 %v2909_v3  ;;  %v231_v3 = vld [vmem:[#allocation4 + $0x4b8] sm:$0xff] }
  0xeb   :  { %1889 = vmatprep.subr.bf16.mxu1 %v2902_v5  ;;  %v2847_v5 = vcombine.low %v235_v60, %v239_v61  ;;  %v2840_v7 = vcombine.high %v227_v2, %v231_v3  ;;  %v87_v18 = vld [vmem:[#allocation4 + $0x38] sm:$0xff] }
  0xec   :  { %1849 = vmatpush2.bf16.msra.mxu0 %v2773_v10  ;;  %v219_v10 = vld [vmem:[#allocation4 + $0x458] sm:$0xff]  ;;  %v2696_v24 = vcombine.high %v83_v17, %v87_v18 }
  0xed   :  { %1850 = vmatprep.subr.bf16.mxu0 %v2766_v12  ;;  %v2711_v12 = vcombine.low %v99_v0, %v103_v1  ;;  %v203_v26 = vld [vmem:[#allocation4 + $0x3d8] sm:$0xff] }
  0xee   :  { %1890 = vmatpush2.bf16.msra.mxu1 %v2901_v11  ;;  %v223_v11 = vld [vmem:[#allocation4 + $0x478] sm:$0xff] }
  0xef   :  { %1891 = vmatprep.subr.bf16.mxu1 %v2894_v13  ;;  %v2839_v13 = vcombine.low %v227_v2, %v231_v3  ;;  %v2832_v15 = vcombine.high %v219_v10, %v223_v11  ;;  %v207_v27 = vld [vmem:[#allocation4 + $0x3f8] sm:$0xff] }
  0xf0   :  { %1851 = vmatpush2.bf16.msra.mxu0 %v2765_v20  ;;  %v211_v20 = vld [vmem:[#allocation4 + $0x418] sm:$0xff]  ;;  %v2816_v32 = vcombine.high %v203_v26, %v207_v27 }
  0xf1   :  { %1852 = vmatprep.subr.bf16.mxu0 %v2758_v22  ;;  %v2703_v22 = vcombine.low %v91_v8, %v95_v9  ;;  %v195_v34 = vld [vmem:[#allocation4 + $0x398] sm:$0xff] }
  0xf2   :  { %1892 = vmatpush2.bf16.msra.mxu1 %v2893_v21  ;;  %v215_v21 = vld [vmem:[#allocation4 + $0x438] sm:$0xff] }
  0xf3   :  { %1893 = vmatprep.subr.bf16.mxu1 %v2886_v23  ;;  %v2831_v23 = vcombine.low %v219_v10, %v223_v11  ;;  %v2824_v25 = vcombine.high %v211_v20, %v215_v21  ;;  %v199_v35 = vld [vmem:[#allocation4 + $0x3b8] sm:$0xff] }
  0xf4   :  { %1853 = vmatpush2.bf16.msra.mxu0 %v2757_v28  ;;  %v331_v28 = vld [vmem:[#allocation4 + $0x7d8] sm:$0xff]  ;;  %v2808_v40 = vcombine.high %v195_v34, %v199_v35 }
  0xf5   :  { %1904 = vmatprep.subr.bf16.mxu0 %v2752_v30  ;;  %v2695_v30 = vcombine.low %v83_v17, %v87_v18  ;;  %v187_v42 = vld [vmem:[#allocation4 + $0x358] sm:$0xff] }
  0xf6   :  { %1894 = vmatpush2.bf16.msra.mxu1 %v2885_v29  ;;  %v335_v29 = vld [vmem:[#allocation4 + $0x7f8] sm:$0xff] }
  0xf7   :  { %1945 = vmatprep.subr.bf16.mxu1 %v2880_v31  ;;  %1855 = vmatmul.mubr.bf16.vlgmr.msra.gmra.mxu0 %v3312_v16  ;;  %v2823_v31 = vcombine.low %v211_v20, %v215_v21  ;;  %v2944_v33 = vcombine.high %v331_v28, %v335_v29  ;;  %v191_v43 = vld [vmem:[#allocation4 + $0x378] sm:$0xff] }
  0xf8   :  { %1905 = vmatpush1.bf16.msra.mxu0 %v2751_v36  ;;  %1936 = vmatprep.mubr.bf16.mxu0 %v3306_v58  ;;  %v2855_v58 = vcombine.low %v243_v50, %v247_v51  ;;  %v323_v36 = vld [vmem:[#allocation4 + $0x798] sm:$0xff]  ;;  %v2800_v48 = vcombine.high %v187_v42, %v191_v43 }
  0xf9   :  { %1896 = vmatmul.mubr.bf16.vlgmr.msra.gmra.mxu1 %v3314_v19  ;;  %1906 = vmatprep.subr.bf16.mxu0 %v2744_v38  ;;  %v2815_v38 = vcombine.low %v203_v26, %v207_v27  ;;  %v179_v50 = vld [vmem:[#allocation4 + $0x318] sm:$0xff] }
  0xfa   :  { %1946 = vmatpush1.bf16.msra.mxu1 %v2879_v37  ;;  %1977 = vmatprep.mubr.bf16.mxu1 %v3308_v59  ;;  %v2848_v59 = vcombine.high %v235_v60, %v239_v61  ;;  %v327_v37 = vld [vmem:[#allocation4 + $0x7b8] sm:$0xff] }
  0xfb   :  { %1947 = vmatprep.subr.bf16.mxu1 %v2872_v39  ;;  %v2943_v39 = vcombine.low %v331_v28, %v335_v29  ;;  %v2936_v41 = vcombine.high %v323_v36, %v327_v37  ;;  %v183_v51 = vld [vmem:[#allocation4 + $0x338] sm:$0xff] }
  0xfc   :  { %1907 = vmatpush1.bf16.msra.mxu0 %v2743_v44  ;;  %v315_v44 = vld [vmem:[#allocation4 + $0x758] sm:$0xff]  ;;  %v2792_v56 = vcombine.high %v179_v50, %v183_v51 }
  0xfd   :  { %1908 = vmatprep.subr.bf16.mxu0 %v2736_v46  ;;  %v2807_v46 = vcombine.low %v195_v34, %v199_v35  ;;  %v171_v60 = vld [vmem:[#allocation4 + $0x2d8] sm:$0xff]  ;;  %v3122_v34 = vld [vmem:[#allocation7 + $0xf8] sm:$0xff]  }
  0xfe   :  { %1948 = vmatpush1.bf16.msra.mxu1 %v2871_v45  ;;  %v319_v45 = vld [vmem:[#allocation4 + $0x778] sm:$0xff]  ;;  %v3331_v35 = vld [vmem:[#allocation6] sm:$0xff] }
  0xff   :  { %1949 = vmatprep.subr.bf16.mxu1 %v2864_v47  ;;  %v2935_v47 = vcombine.low %v323_v36, %v327_v37  ;;  %v2928_v49 = vcombine.high %v315_v44, %v319_v45  ;;  %v175_v61 = vld [vmem:[#allocation4 + $0x2f8] sm:$0xff]  ;;  %v3107_v36 = vld [vmem:[#allocation7 + $0x38] sm:$0xff]  }
 0x100   :  { %1909 = vmatpush1.bf16.msra.mxu0 %v2735_v52  ;;  %v307_v52 = vld [vmem:[#allocation4 + $0x718] sm:$0xff]  ;;  %v2784_v0 = vcombine.high %v171_v60, %v175_v61 }
 0x101   :  { %1910 = vmatprep.subr.bf16.mxu0 %v2728_v54  ;;  %v2799_v54 = vcombine.low %v187_v42, %v191_v43  ;;  %v163_v2 = vld [vmem:[#allocation4 + $0x298] sm:$0xff] }
 0x102   :  { %1950 = vmatpush1.bf16.msra.mxu1 %v2863_v53  ;;  %v311_v53 = vld [vmem:[#allocation4 + $0x738] sm:$0xff] }
 0x103   :  { %1951 = vmatprep.subr.bf16.mxu1 %v2856_v55  ;;  %v2927_v55 = vcombine.low %v315_v44, %v319_v45  ;;  %v2920_v57 = vcombine.high %v307_v52, %v311_v53  ;;  %v167_v3 = vld [vmem:[#allocation4 + $0x2b8] sm:$0xff]  ;;  %v3110_v45 = vld [vmem:[#allocation7 + $0x68] sm:$0xff]  }
 0x104   :  { %1911 = vmatpush1.bf16.msra.mxu0 %v2727_v62  ;;  %v299_v62 = vld [vmem:[#allocation4 + $0x6d8] sm:$0xff]  ;;  %v2776_v8 = vcombine.high %v163_v2, %v167_v3 }
 0x105   :  { %1912 = vmatprep.subr.bf16.mxu0 %v2720_v63  ;;  %v2791_v63 = vcombine.low %v179_v50, %v183_v51  ;;  %v155_v10 = vld [vmem:[#allocation4 + $0x258] sm:$0xff] }
 0x106   :  { %1952 = vmatpush1.bf16.msra.mxu1 %v2855_v58  ;;  %v303_v58 = vld [vmem:[#allocation4 + $0x6f8] sm:$0xff] }
 0x107   :  { %1953 = vmatprep.subr.bf16.mxu1 %v2848_v59  ;;  %v2919_v59 = vcombine.low %v307_v52, %v311_v53  ;;  %v2912_v1 = vcombine.high %v299_v62, %v303_v58  ;;  %v159_v11 = vld [vmem:[#allocation4 + $0x278] sm:$0xff]  ;;  %v3111_v53 = vld [vmem:[#allocation7 + $0x28] sm:$0xff]  }
 0x108   :  { %1913 = vmatpush1.bf16.msra.mxu0 %v2719_v4  ;;  %v291_v4 = vld [vmem:[#allocation4 + $0x698] sm:$0xff]  ;;  %v2768_v17 = vcombine.high %v155_v10, %v159_v11 }
 0x109   :  { %1914 = vmatprep.subr.bf16.mxu0 %v2712_v6  ;;  %v2783_v6 = vcombine.low %v171_v60, %v175_v61  ;;  %v147_v20 = vld [vmem:[#allocation4 + $0x218] sm:$0xff]  ;;  %v3113_v61 = vld [vmem:[#allocation7 + $0x20] sm:$0xff]  }
 0x10a   :  { %1954 = vmatpush1.bf16.msra.mxu1 %v2847_v5  ;;  %v295_v5 = vld [vmem:[#allocation4 + $0x6b8] sm:$0xff] }
 0x10b   :  { %1955 = vmatprep.subr.bf16.mxu1 %v2840_v7  ;;  %v2911_v7 = vcombine.low %v299_v62, %v303_v58  ;;  %v2904_v9 = vcombine.high %v291_v4, %v295_v5  ;;  %v151_v21 = vld [vmem:[#allocation4 + $0x238] sm:$0xff]  ;;  %v3114_v58 = vld [vmem:[#allocation7 + $0x58] sm:$0xff]  }
 0x10c   :  { %1915 = vmatpush1.bf16.msra.mxu0 %v2711_v12  ;;  %v283_v12 = vld [vmem:[#allocation4 + $0x658] sm:$0xff]  ;;  %v2760_v27 = vcombine.high %v147_v20, %v151_v21 }
 0x10d   :  { %1916 = vmatprep.subr.bf16.mxu0 %v2704_v14  ;;  %v2775_v14 = vcombine.low %v163_v2, %v167_v3  ;;  %v3108_v37 = vld [vmem:[#allocation7 + $0x70] sm:$0xff]   ;;  %v3131_v3 = vld [vmem:[#allocation7 + $0x98] sm:$0xff]  }
 0x10e   :  { %1956 = vmatpush1.bf16.msra.mxu1 %v2839_v13  ;;  %v287_v13 = vld [vmem:[#allocation4 + $0x678] sm:$0xff] }
 0x10f   :  { %1957 = vmatprep.subr.bf16.mxu1 %v2832_v15  ;;  %v2903_v15 = vcombine.low %v291_v4, %v295_v5  ;;  %v2896_v18 = vcombine.high %v283_v12, %v287_v13  ;;  %v2895_v26 = vcombine.low %v283_v12, %v287_v13  ;;  %v3109_v43 = vld [vmem:[#allocation7 + $0x30] sm:$0xff]   ;;  %v3120_v12 = vld [vmem:[#allocation7 + $0x40] sm:$0xff]   ;;  %v3135_v13 = vld [vmem:[#allocation7 + $0x88] sm:$0xff]  }
 0x110   :  { %1917 = vmatpush1.bf16.msra.mxu0 %v2703_v22  ;;  %v338_v22 = vlaneseq  ;;  %v3116_v2 = vld [vmem:[#allocation7 + $0x50] sm:$0xff]  }
 0x111   :  { %1918 = vmatprep.subr.bf16.mxu0 %v2696_v24  ;;  %v279_v24 = vld [vmem:[#allocation4 + $0x638] sm:$0xff] }
 0x112   :  { %1958 = vmatpush1.bf16.msra.mxu1 %v2831_v23  ;;  %v275_v23 = vld [vmem:[#allocation4 + $0x618] sm:$0xff]  ;;  %v3328_v29 = vshrl.u32 %v338_v22, 7  ;;  %v3139_v22 = vld [vmem:[#allocation7 + $0x138] sm:$0xff]  }
 0x113   :  { %1959 = vmatprep.subr.bf16.mxu1 %v2824_v25  ;;  %v2767_v25 = vcombine.low %v155_v10, %v159_v11  ;;  %v2888_v28 = vcombine.high %v275_v23, %v279_v24  ;;  %v3132_v4 = vld [vmem:[#allocation7 + $0xd0] sm:$0xff]   ;;  %v3119_v10 = vld [vmem:[#allocation7 + $0x8] sm:$0xff]  }
 0x114   :  { %1919 = vmatpush1.bf16.msra.mxu0 %v2695_v30  ;;  %v2759_v30 = vcombine.low %v147_v20, %v151_v21  ;;  %v340_v62 = vsub.s32 0, %v3328_v29  ;;  %v3117_v5 = vld [vmem:[#allocation7 + $0x10] sm:$0xff]   ;;  %v3138_v20 = vld [vmem:[#allocation7 + $0x178] sm:$0xff]  }
 0x115   :  { %1920 = vmatprep.subr.bf16.mxu0 %v2816_v32  ;;  %v3106_v32 = vld [vmem:[#allocation7 + $0x78] sm:$0xff]  }
 0x116   :  { %1960 = vmatpush1.bf16.msra.mxu1 %v2823_v31  ;;  %v2887_v31 = vcombine.low %v275_v23, %v279_v24  ;;  %v3154_v21 = vld [vmem:[#allocation7 + $0x1f8] sm:$0xff]   ;;  %v3140_v24 = vld [vmem:[#allocation7 + $0x170] sm:$0xff]  }
 0x117   :  { %1961 = vmatprep.subr.bf16.mxu1 %v2944_v33  ;;  %v344_v33 = vsub.s32 1, %v3328_v29 }
 0x118   :  { %1921 = vmatpush2.bf16.msra.mxu0 %v2815_v38  ;;  %v3123_v38 = vld [vmem:[#allocation7 + $0xb8] sm:$0xff]  }
 0x119   :  { %1922 = vmatprep.subr.bf16.mxu0 %v2808_v40  ;;  %v3124_v40 = vld [vmem:[#allocation7 + $0xf0] sm:$0xff]  }
 0x11a   :  { %1962 = vmatpush2.bf16.msra.mxu1 %v2943_v39  ;;  %v345_v39 = vrot.slane %v3331_v35, %v344_v33  ;;  %v3148_v33 = vld [vmem:[#allocation7 + $0x150] sm:$0xff]  }
 0x11b   :  { %1963 = vmatprep.subr.bf16.mxu1 %v2936_v41 }
 0x11c   :  { %1923 = vmatpush2.bf16.msra.mxu0 %v2807_v46  ;;  %v3125_v46 = vld [vmem:[#allocation7 + $0xb0] sm:$0xff]  }
 0x11d   :  { %1924 = vmatprep.subr.bf16.mxu0 %v2800_v48 }
 0x11e   :  { %1964 = vmatpush2.bf16.msra.mxu1 %v2935_v47 }
 0x11f   :  { %1965 = vmatprep.subr.bf16.mxu1 %v2928_v49  ;;  %v3126_v49 = vld [vmem:[#allocation7 + $0xe8] sm:$0xff]  }
 0x120   :  { %1925 = vmatpush2.bf16.msra.mxu0 %v2799_v54  ;;  %v3112_v54 = vld [vmem:[#allocation7 + $0x60] sm:$0xff]  }
 0x121   :  { %1926 = vmatprep.subr.bf16.mxu0 %v2792_v56 }
 0x122   :  { %1966 = vmatpush2.bf16.msra.mxu1 %v2927_v55 }
 0x123   :  { %1967 = vmatprep.subr.bf16.mxu1 %v2920_v57  ;;  %v3128_v57 = vld [vmem:[#allocation7 + $0xe0] sm:$0xff]  }
 0x124   :  { %1927 = vmatpush2.bf16.msra.mxu0 %v2791_v63  ;;  %v3129_v63 = vld [vmem:[#allocation7 + $0xa0] sm:$0xff]  }
 0x125   :  { %1928 = vmatprep.subr.bf16.mxu0 %v2784_v0  ;;  %v3115_v0 = vld [vmem:[#allocation7 + $0x18] sm:$0xff]  }
 0x126   :  { %1968 = vmatpush2.bf16.msra.mxu1 %v2919_v59  ;;  %v3130_v59 = vld [vmem:[#allocation7 + $0xd8] sm:$0xff]  }
 0x127   :  { %1969 = vmatprep.subr.bf16.mxu1 %v2912_v1  ;;  %v341_v1 = vrot.slane %v3331_v35, %v340_v62  ;;  %v3157_v62 = vld [vmem:[#allocation7 + $0x1b0] sm:$0xff]  }
 0x128   :  { %1929 = vmatpush2.bf16.msra.mxu0 %v2783_v6 }
 0x129   :  { %1930 = vmatprep.subr.bf16.mxu0 %v2776_v8  ;;  %v3133_v8 = vld [vmem:[#allocation7 + $0x90] sm:$0xff]  }
 0x12a   :  { %1970 = vmatpush2.bf16.msra.mxu1 %v2911_v7  ;;  %v3118_v7 = vld [vmem:[#allocation7 + $0x48] sm:$0xff]  }
 0x12b   :  { %1971 = vmatprep.subr.bf16.mxu1 %v2904_v9  ;;  %v3134_v9 = vld [vmem:[#allocation7 + $0xc8] sm:$0xff]  }
 0x12c   :  { %1931 = vmatpush2.bf16.msra.mxu0 %v2775_v14  ;;  %v3136_v14 = vld [vmem:[#allocation7 + $0xc0] sm:$0xff]  }
 0x12d   :  { %1932 = vmatprep.subr.bf16.mxu0 %v2768_v17 }
 0x12e   :  { %1972 = vmatpush2.bf16.msra.mxu1 %v2903_v15  ;;  %v3121_v15 = vld [vmem:[#allocation7] sm:$0xff]  }
 0x12f   :  { %1973 = vmatprep.subr.bf16.mxu1 %v2896_v18  ;;  %v3137_v18 = vld [vmem:[#allocation7 + $0x80] sm:$0xff]  }
 0x130   :  { %1933 = vmatpush2.bf16.msra.mxu0 %v2767_v25  ;;  %v3141_v25 = vld [vmem:[#allocation7 + $0x130] sm:$0xff]  }
 0x131   :  { %1934 = vmatprep.subr.bf16.mxu0 %v2760_v27  ;;  %v3143_v27 = vld [vmem:[#allocation7 + $0x128] sm:$0xff]  }
 0x132   :  { %1974 = vmatpush2.bf16.msra.mxu1 %v2895_v26  ;;  %v3142_v26 = vld [vmem:[#allocation7 + $0x168] sm:$0xff]  }
 0x133   :  { %1975 = vmatprep.subr.bf16.mxu1 %v2888_v28  ;;  %v3144_v28 = vld [vmem:[#allocation7 + $0x160] sm:$0xff]  }
 0x134   :  { %1935 = vmatpush2.bf16.msra.mxu0 %v2759_v30  ;;  %v3145_v30 = vld [vmem:[#allocation7 + $0x120] sm:$0xff]  }
 0x135   :  { %3010 = vmatprep.subr.bf16.mxu0 %v3106_v32  ;;  %v3147_v32 = vld [vmem:[#allocation7 + $0x118] sm:$0xff]  }
 0x136   :  { %1976 = vmatpush2.bf16.msra.mxu1 %v2887_v31  ;;  %v3146_v31 = vld [vmem:[#allocation7 + $0x158] sm:$0xff]  }
 0x137   :  { %3032 = vmatprep.subr.bf16.mxu1 %v3122_v34  ;;  %v1692_v41 = vpop.f32.mrf.mxu0  ;;  %1937 = vmatmul.mubr.bf16.vlgmr.msra.gmra.mxu0 %v3312_v16  ;;  %v3149_v34 = vld [vmem:[#allocation7 + $0x110] sm:$0xff]  }
 0x138   :  { %3011 = vmatpush3.bf16.msra.mxu0 %v3107_v36  ;;  %v1693_v6 = vadd.f32 %v1692_v41, %v341_v1  ;;  %v3150_v36 = vld [vmem:[#allocation7 + $0x148] sm:$0xff]   ;;  %v352_v41 = vsub.s32 3, %v3328_v29  ;;  %v3162_v1 = vld [vmem:[#allocation7 + $0x1d8] sm:$0xff]  }
 0x139   :  { %v1733_v42 = vpop.f32.mrf.mxu1  ;;  %1978 = vmatmul.mubr.bf16.vlgmr.msra.gmra.mxu1 %v3314_v19  ;;  %v1694_v44 = vpop.f32.mrf.mxu0  ;;  %3012 = vmatprep.subr.bf16.mxu0 %v3108_v37  ;;  %v3127_v19 = vld [vmem:[#allocation7 + $0xa8] sm:$0xff]  }
 0x13a   :  { %3033 = vmatpush3.bf16.msra.mxu1 %v3123_v38  ;;  %v1695_v47 = vadd.f32 %v1694_v44, %v345_v39  ;;  %v1734_v11 = vadd.f32 %v1733_v42, %v1693_v6  ;;  %v3151_v37 = vld [vmem:[#allocation7 + $0x108] sm:$0xff]   ;;  %v3152_v38 = vld [vmem:[#allocation7 + $0x140] sm:$0xff]   ;;  %v348_v39 = vsub.s32 2, %v3328_v29 }
 0x13b   :  { %v1735_v48 = vpop.f32.mrf.mxu1  ;;  %3034 = vmatprep.subr.bf16.mxu1 %v3124_v40  ;;  %v1696_v50 = vpop.f32.mrf.mxu0  ;;  %v3153_v40 = vld [vmem:[#allocation7 + $0x100] sm:$0xff]   ;;  %v3167_v6 = vld [vmem:[#allocation7 + $0x188] sm:$0xff]  }
 0x13c   :  { %v1736_v51 = vadd.f32 %v1735_v48, %v1695_v47  ;;  %3013 = vmatpush3.bf16.msra.mxu0 %v3109_v43  ;;  %v1986_v17 = vmax.f32 %v1734_v11, 0.0  ;;  %v349_v42 = vrot.slane %v3331_v35, %v348_v39  ;;  %v353_v43 = vrot.slane %v3331_v35, %v352_v41 }
 0x13d   :  { %v1737_v52 = vpop.f32.mrf.mxu1  ;;  %v1697_v16 = vpop.f32.mrf.mxu0  ;;  %3014 = vmatprep.subr.bf16.mxu0 %v3110_v45 }
 0x13e   :  { %3035 = vmatpush3.bf16.msra.mxu1 %v3125_v46  ;;  %v1987_v55 = vmax.f32 %v1736_v51, 0.0  ;;  %v1994_v23 = vpack.c.bf16 %v1986_v17, %v1986_v17 }
 0x13f   :  { %v1738_v56 = vpop.f32.mrf.mxu1  ;;  %3036 = vmatprep.subr.bf16.mxu1 %v3126_v49 }
 0x140   :  { %v1995_v60 = vpack.c.bf16 %v1987_v55, %v1987_v55  ;;  %3015 = vmatpush3.bf16.msra.mxu0 %v3111_v53 }
 0x141   :  { %3016 = vmatprep.subr.bf16.mxu0 %v3112_v54 }
 0x142   :  { %3037 = vmatpush3.bf16.msra.mxu1 %v3127_v19  ;;  %2553 = vmatprep.mubr.bf16.mxu0 %v1995_v60 }
 0x143   :  { %3038 = vmatprep.subr.bf16.mxu1 %v3128_v57  ;;  %v3155_v57 = vld [vmem:[#allocation7 + $0x1b8] sm:$0xff]  }
 0x144   :  { %3017 = vmatpush3.bf16.msra.mxu0 %v3113_v61  ;;  %v3156_v61 = vld [vmem:[#allocation7 + $0x1f0] sm:$0xff]  }
 0x145   :  { %3018 = vmatprep.subr.bf16.mxu0 %v3114_v58  ;;  %v3158_v58 = vld [vmem:[#allocation7 + $0x1e8] sm:$0xff]  }
 0x146   :  { %3039 = vmatpush3.bf16.msra.mxu1 %v3129_v63  ;;  %v3159_v63 = vld [vmem:[#allocation7 + $0x1a8] sm:$0xff]  }
 0x147   :  { %3040 = vmatprep.subr.bf16.mxu1 %v3130_v59  ;;  %v3160_v59 = vld [vmem:[#allocation7 + $0x1e0] sm:$0xff]  }
 0x148   :  { %3019 = vmatpush3.bf16.msra.mxu0 %v3115_v0  ;;  %v3161_v0 = vld [vmem:[#allocation7 + $0x1a0] sm:$0xff]  }
 0x149   :  { %3020 = vmatprep.subr.bf16.mxu0 %v3116_v2  ;;  %v3163_v2 = vld [vmem:[#allocation7 + $0x198] sm:$0xff]  }
 0x14a   :  { %3041 = vmatpush3.bf16.msra.mxu1 %v3131_v3  ;;  %v3164_v3 = vld [vmem:[#allocation7 + $0x1d0] sm:$0xff]  }
 0x14b   :  { %3042 = vmatprep.subr.bf16.mxu1 %v3132_v4  ;;  %v3165_v4 = vld [vmem:[#allocation7 + $0x190] sm:$0xff]  }
 0x14c   :  { %3021 = vmatpush3.bf16.msra.mxu0 %v3117_v5  ;;  %v3166_v5 = vld [vmem:[#allocation7 + $0x1c8] sm:$0xff]  }
 0x14d   :  { %3022 = vmatprep.subr.bf16.mxu0 %v3118_v7  ;;  %v3168_v7 = vld [vmem:[#allocation7 + $0x1c0] sm:$0xff]  }
 0x14e   :  { %3043 = vmatpush3.bf16.msra.mxu1 %v3133_v8  ;;  %v3169_v8 = vld [vmem:[#allocation7 + $0x180] sm:$0xff]  }
 0x14f   :  { %3044 = vmatprep.subr.bf16.mxu1 %v3134_v9  ;;  %v356_v9 = vsub.s32 4, %v3328_v29 }
 0x150   :  { %3023 = vmatpush3.bf16.msra.mxu0 %v3119_v10  ;;  %v360_v10 = vsub.s32 5, %v3328_v29 }
 0x151   :  { %3024 = vmatprep.subr.bf16.mxu0 %v3120_v12  ;;  %v357_v11 = vrot.slane %v3331_v35, %v356_v9 }
 0x152   :  { %3045 = vmatpush3.bf16.msra.mxu1 %v3135_v13  ;;  %v361_v12 = vrot.slane %v3331_v35, %v360_v10 }
 0x153   :  { %3046 = vmatprep.subr.bf16.mxu1 %v3136_v14 }
 0x154   :  { %3025 = vmatpush3.bf16.msra.mxu0 %v3121_v15 }
 0x155   :  { %3054 = vmatprep.subr.bf16.mxu0 %v3138_v20 }
 0x156   :  { %3047 = vmatpush3.bf16.msra.mxu1 %v3137_v18 }
 0x157   :  { %3076 = vmatprep.subr.bf16.mxu1 %v3154_v21  ;;  %2554 = vmatmul.mubr.bf16.vlgmr.msra.gmra.mxu0 %v1994_v23 }
 0x158   :  { %3055 = vmatpush3.bf16.msra.mxu0 %v3139_v22 }
 0x159   :  { %3056 = vmatprep.subr.bf16.mxu0 %v3140_v24 }
 0x15c   :  { %3057 = vmatpush3.bf16.msra.mxu0 %v3141_v25 }
 0x15d   :  { %3058 = vmatprep.subr.bf16.mxu0 %v3142_v26 }
 0x160   :  { %3059 = vmatpush3.bf16.msra.mxu0 %v3143_v27 }
 0x161   :  { %3060 = vmatprep.subr.bf16.mxu0 %v3144_v28 }
 0x164   :  { %3061 = vmatpush3.bf16.msra.mxu0 %v3145_v30 }
 0x165   :  { %3062 = vmatprep.subr.bf16.mxu0 %v3146_v31 }
 0x168   :  { %3063 = vmatpush3.bf16.msra.mxu0 %v3147_v32  ;;  %v364_v32 = vsub.s32 6, %v3328_v29 }
 0x169   :  { %3064 = vmatprep.subr.bf16.mxu0 %v3148_v33  ;;  %v368_v33 = vsub.s32 7, %v3328_v29 }
 0x16c   :  { %3065 = vmatpush3.bf16.msra.mxu0 %v3149_v34  ;;  %v365_v34 = vrot.slane %v3331_v35, %v364_v32 }
 0x16d   :  { %3066 = vmatprep.subr.bf16.mxu0 %v3150_v36  ;;  %v369_v36 = vrot.slane %v3331_v35, %v368_v33 }
 0x170   :  { %3067 = vmatpush3.bf16.msra.mxu0 %v3151_v37 }
 0x171   :  { %3068 = vmatprep.subr.bf16.mxu0 %v3152_v38 }
 0x174   :  { %3069 = vmatpush3.bf16.msra.mxu0 %v3153_v40 }
 0x177   :  { %v1774_v44 = vpop.f32.mrf.mxu0 }
 0x178   :  { %v1775_v45 = vadd.f32 %v1774_v44, %v349_v42 }
 0x179   :  { %v1815_v46 = vpop.f32.mrf.mxu1  ;;  %v1776_v47 = vpop.f32.mrf.mxu0 }
 0x17a   :  { %v1816_v48 = vadd.f32 %v1815_v46, %v1775_v45  ;;  %v1777_v49 = vadd.f32 %v1776_v47, %v353_v43 }
 0x17b   :  { %v1817_v50 = vpop.f32.mrf.mxu1  ;;  %v1778_v51 = vpop.f32.mrf.mxu0 }
 0x17c   :  { %v1818_v52 = vadd.f32 %v1817_v50, %v1777_v49  ;;  %v1988_v16 = vmax.f32 %v1816_v48, 0.0 }
 0x17d   :  { %v1819_v53 = vpop.f32.mrf.mxu1  ;;  %v1779_v54 = vpop.f32.mrf.mxu0 }
 0x17e   :  { %v1989_v19 = vmax.f32 %v1818_v52, 0.0  ;;  %v1996_v60 = vpack.c.bf16 %v1988_v16, %v1988_v16 }
 0x17f   :  { %v1820_v55 = vpop.f32.mrf.mxu1 }
 0x180   :  { %v1997_v56 = vpack.c.bf16 %v1989_v19, %v1989_v19  ;;  %v2945_v19 = vld [vmem:[%s3360_s4] ss:$0 sm:$0xff] }
 0x182   :  { %2593 = vmatprep.mubr.bf16.mxu1 %v1997_v56 }
 0x183   :  { %2594 = vmatmul.mubr.bf16.vlgmr.msra.gmra.mxu1 %v1996_v60 }
 0x184   :  { %3077 = vmatpush3.bf16.msra.mxu1 %v3155_v57 }
 0x185   :  { %3078 = vmatprep.subr.bf16.mxu1 %v3156_v61 }
 0x188   :  { %3079 = vmatpush3.bf16.msra.mxu1 %v3157_v62 }
 0x189   :  { %3080 = vmatprep.subr.bf16.mxu1 %v3158_v58 }
 0x18c   :  { %3081 = vmatpush3.bf16.msra.mxu1 %v3159_v63 }
 0x18d   :  { %3082 = vmatprep.subr.bf16.mxu1 %v3160_v59 }
 0x190   :  { %3083 = vmatpush3.bf16.msra.mxu1 %v3161_v0 }
 0x191   :  { %3084 = vmatprep.subr.bf16.mxu1 %v3162_v1 }
 0x194   :  { %3085 = vmatpush3.bf16.msra.mxu1 %v3163_v2 }
 0x195   :  { %3086 = vmatprep.subr.bf16.mxu1 %v3164_v3 }
 0x198   :  { %3087 = vmatpush3.bf16.msra.mxu1 %v3165_v4 }
 0x199   :  { %3088 = vmatprep.subr.bf16.mxu1 %v3166_v5 }
 0x19c   :  { %3089 = vmatpush3.bf16.msra.mxu1 %v3167_v6 }
 0x19d   :  { %3090 = vmatprep.subr.bf16.mxu1 %v3168_v7 }
 0x1a0   :  { %3091 = vmatpush3.bf16.msra.mxu1 %v3169_v8 }
 0x1b7   :  { %v1856_v13 = vpop.f32.mrf.mxu0 }
 0x1b8   :  { %v1857_v14 = vadd.f32 %v1856_v13, %v357_v11 }
 0x1b9   :  { %v1897_v15 = vpop.f32.mrf.mxu1  ;;  %v1858_v17 = vpop.f32.mrf.mxu0 }
 0x1ba   :  { %v1898_v18 = vadd.f32 %v1897_v15, %v1857_v14  ;;  %v1859_v20 = vadd.f32 %v1858_v17, %v361_v12 }
 0x1bb   :  { %v1899_v21 = vpop.f32.mrf.mxu1  ;;  %v1860_v22 = vpop.f32.mrf.mxu0 }
 0x1bc   :  { %v1900_v23 = vadd.f32 %v1899_v21, %v1859_v20  ;;  %v1990_v25 = vmax.f32 %v1898_v18, 0.0 }
 0x1bd   :  { %v1901_v24 = vpop.f32.mrf.mxu1  ;;  %v1861_v26 = vpop.f32.mrf.mxu0 }
 0x1be   :  { %v1991_v27 = vmax.f32 %v1900_v23, 0.0  ;;  %v1998_v31 = vpack.c.bf16 %v1990_v25, %v1990_v25 }
 0x1bf   :  { %v1902_v28 = vpop.f32.mrf.mxu1 }
 0x1c0   :  { %v1999_v30 = vpack.c.bf16 %v1991_v27, %v1991_v27 }
 0x1c2   :  { %2633 = vmatprep.mubr.bf16.mxu0 %v1999_v30 }
 0x1c3   :  { %2634 = vmatmul.mubr.bf16.vlgmr.msra.gmra.mxu0 %v1998_v31 }
 0x1f7   :  { %v1938_v37 = vpop.f32.mrf.mxu0 }
 0x1f8   :  { %v1939_v38 = vadd.f32 %v1938_v37, %v365_v34 }
 0x1f9   :  { %v1979_v39 = vpop.f32.mrf.mxu1  ;;  %v1940_v40 = vpop.f32.mrf.mxu0 }
 0x1fa   :  { %v1980_v41 = vadd.f32 %v1979_v39, %v1939_v38  ;;  %v1941_v42 = vadd.f32 %v1940_v40, %v369_v36 }
 0x1fb   :  { %v1981_v43 = vpop.f32.mrf.mxu1  ;;  %v1942_v44 = vpop.f32.mrf.mxu0 }
 0x1fc   :  { %v1982_v45 = vadd.f32 %v1981_v43, %v1941_v42  ;;  %v1992_v47 = vmax.f32 %v1980_v41, 0.0 }
 0x1fd   :  { %v1983_v46 = vpop.f32.mrf.mxu1  ;;  %v1943_v48 = vpop.f32.mrf.mxu0 }
 0x1fe   :  { %v1993_v49 = vmax.f32 %v1982_v45, 0.0  ;;  %v2000_v29 = vpack.c.bf16 %v1992_v47, %v1992_v47 }
 0x1ff   :  { %v1984_v50 = vpop.f32.mrf.mxu1 }
 0x200   :  { %v2001_v51 = vpack.c.bf16 %v1993_v49, %v1993_v49 }
 0x202   :  { %2673 = vmatprep.mubr.bf16.mxu1 %v2001_v51 }
 0x203   :  { %2674 = vmatmul.mubr.bf16.vlgmr.msra.gmra.mxu1 %v2000_v29 }
 0x217   :  { %v3026_v52 = vpop.f32.mrf.mxu0 }
 0x219   :  { %v3027_v35 = vpop.f32.mrf.mxu0 }
 0x21a   :  { %v3028_v53 = vadd.f32 %v3027_v35, %v3026_v52 }
 0x21b   :  { %v3029_v16 = vpop.f32.mrf.mxu0 }
 0x21c   :  { %v2556_v57 = vadd.f32 %v3028_v53, %v2945_v19 }
 0x21d   :  { %v3030_v54 = vpop.f32.mrf.mxu0 }
 0x243   :  { %v3048_v55 = vpop.f32.mrf.mxu1 }
 0x245   :  { %v3049_v56 = vpop.f32.mrf.mxu1 }
 0x246   :  { %v3050_v60 = vadd.f32 %v3049_v56, %v3048_v55 }
 0x247   :  { %v3051_v61 = vpop.f32.mrf.mxu1 }
 0x248   :  { %v2596_v62 = vadd.f32 %v3050_v60, %v2556_v57 }
 0x249   :  { %v3052_v58 = vpop.f32.mrf.mxu1 }
 0x283   :  { %v3070_v63 = vpop.f32.mrf.mxu0 }
 0x285   :  { %v3071_v59 = vpop.f32.mrf.mxu0 }
 0x286   :  { %v3072_v0 = vadd.f32 %v3071_v59, %v3070_v63 }
 0x287   :  { %v3073_v1 = vpop.f32.mrf.mxu0 }
 0x288   :  { %v2636_v2 = vadd.f32 %v3072_v0, %v2596_v62 }
 0x289   :  { %v3074_v3 = vpop.f32.mrf.mxu0 }
 0x2c3   :  { %v3092_v4 = vpop.f32.mrf.mxu1 }
 0x2c5   :  { %v3093_v5 = vpop.f32.mrf.mxu1 }
 0x2c6   :  { %v3094_v6 = vadd.f32 %v3093_v5, %v3092_v4 }
 0x2c7   :  { %v3095_v7 = vpop.f32.mrf.mxu1 }
 0x2c8   :  { %v2676_v8 = vadd.f32 %v3094_v6, %v2636_v2 }
 0x2c9   :  { %v3096_v9 = vpop.f32.mrf.mxu1 }
 0x2ca   :  { %2681 = vst [vmem:[%s3361_s5] sm:$0xff] %v2676_v8 }
 0x2cb   :  { %2686 = vsyncpa [#allocation3], 1 }
 0x2cc   :  { %2687 = vsyncpa [#allocation5], 1 }
 0x2cd   :  { %2688 = vsyncpa [#allocation8], 1 }

</bundles_post_ra>
